<compile_context>
chip_gen: v5e
topology: v5e:2x2
jax: 0.10.0
libtpu: 0.0.40
codegen_flags: <defaults>
</compile_context>

<pallas_src>
import functools
import math

import jax
import jax.numpy as jnp
import numpy as np
from jax.experimental import pallas as pl
from jax.experimental.pallas import tpu as pltpu

# ---------------- ModelConfig (small, consistent with the forward pass) -----
SEQ_LENGTH = 4
EEG_NUM = 6
EOG_NUM = 2
CHANNELS = EEG_NUM + EOG_NUM          # 8
FEAT_LEN = 16                         # per-channel feature length L
D_MODEL = 32
D_FF = 64
N_HEAD = 4
LAYER_NUM = 2
BATCH = 2
N_EPOCHS = BATCH * SEQ_LENGTH         # leading dim of each input signal
LANES = 128

assert FEAT_LEN > 1, "unbiased std needs at least 2 samples per channel"
assert CHANNELS * FEAT_LEN == LANES   # packed input is exactly one lane-dense row


def _round_up(v, m):
    return (v + m - 1) // m * m


def _layout(n, c, l, n_head, d_model, d_ff, n_layers):
    """Row layout of the two host-packed slabs (shared by pack_params & kernel)."""
    cl = c * l
    hn = n_head * n
    row_neg = c                           # after the segment-indicator rows
    row_hmask = row_neg + hn
    row_misc = row_hmask + hn             # cfc_mean, cfc_std, fused fusion bias
    row_lvec = _round_up(row_misc + 3, 8) # 8 bias/LN rows per encoder layer
    const_rows = _round_up(row_lvec + 8 * n_layers, 8)
    per_layer = 3 * d_model + d_ff        # wqkv(d) + wo(d) + w1(d) + w2(d_ff) rows
    w_rows = _round_up(cl + n_layers * per_layer, 16)
    return dict(cl=cl, hn=hn, row_neg=row_neg, row_hmask=row_hmask,
                row_misc=row_misc, row_lvec=row_lvec, const_rows=const_rows,
                per_layer=per_layer, w_rows=w_rows)


def _layer_norm(x, g, b, eps=1e-5):
    mu = jnp.mean(x, axis=-1, keepdims=True)
    var = jnp.mean((x - mu) ** 2, axis=-1, keepdims=True)
    return (x - mu) * jax.lax.rsqrt(var + eps) * g + b


# ---------------------------------------------------------------------------
# The single fused kernel: SRM gating + modality/all fusion + encoder + tanh
# ---------------------------------------------------------------------------
def att_fu_encode_kernel(*refs, n_chan, seg_len, n_head, n_layers, d_model, d_ff):
    f32, bf16 = jnp.float32, jnp.bfloat16
    c, l = n_chan, seg_len
    sig_refs = refs[:c]                               # 8 signals, each (N, L)
    const_ref, w_ref, out_ref = refs[c], refs[c + 1], refs[c + 2]

    n = sig_refs[0].shape[0]
    cl = c * l
    hn = n_head * n
    lay = _layout(n, c, l, n_head, d_model, d_ff, n_layers)

    # lane-dense input assembly in VMEM (replaces the wrapper-side concat):
    # x[:, ci*L:(ci+1)*L] = signal ci
    x = jnp.concatenate([r[...] for r in sig_refs], axis=-1)          # (N, C*L)

    # ---------------- SRM channel attention ---------------------------------
    segT = const_ref[0:c, :]                                           # (C, C*L) 0/1
    # ONE MXU push for both per-channel sums and squared sums
    x2 = jnp.concatenate([x, x * x], axis=0)                           # (2N, C*L)
    s12 = jax.lax.dot_general(x2, segT, (((1,), (1,)), ((), ())),
                              preferred_element_type=f32)              # (2N, C)
    s1, s2 = s12[0:n], s12[n:2 * n]
    mean = s1 * (1.0 / l)
    # TODO(synk): one-pass unbiased variance; may cancel badly for signals with
    # a large DC offset (reference uses the two-pass formula).
    var = (s2 - mean * s1) * (1.0 / (l - 1))
    std = jnp.sqrt(jnp.maximum(var, 0.0))

    misc = const_ref[lay['row_misc']:lay['row_misc'] + 8, :]
    cfc_m = misc[0:1, 0:c]
    cfc_s = misc[1:2, 0:c]
    af_b = misc[2:3, 0:d_model]
    # TODO(synk): SRM BatchNorm1d applied with default eval stats (identity);
    # real running stats / affine params are not available from the spec.
    g = jax.nn.sigmoid(mean * cfc_m + std * cfc_s)                     # (N, C)

    # broadcast the per-channel gate back onto the lane axis: x.mul(attention)
    g_lanes = jnp.dot(g, segT, preferred_element_type=f32)             # (N, C*L)
    xg = x * g_lanes

    # modality-fusion 1x1 convs + all-modality Linear, folded to one bf16 matmul
    w_all = w_ref[0:cl, :][:, 0:d_model]                               # (C*L, D) bf16
    h = jnp.dot(xg.astype(bf16), w_all, preferred_element_type=f32) + af_b

    # ---------------- post-LN transformer encoder ---------------------------
    # precomputed masks (host-packed): block-diagonal sequence mask replicated
    # per head on the sublane axis, and the per-head lane mask.
    neg_t = const_ref[lay['row_neg']:lay['row_neg'] + hn, :][:, 0:n]          # (H*N, N)
    head_mask = const_ref[lay['row_hmask']:lay['row_hmask'] + hn, :][:, 0:d_model]

    for li in range(n_layers):                        # 2 layers, unrolled
        base = cl + li * lay['per_layer']
        wblk = w_ref[base:base + lay['per_layer'], :]                  # bf16 block
        wqkv = wblk[0:d_model, 0:3 * d_model]
        wo = wblk[d_model:2 * d_model, 0:d_model]
        w1 = wblk[2 * d_model:3 * d_model, 0:d_ff]
        w2 = wblk[3 * d_model:3 * d_model + d_ff, 0:d_model]

        r = lay['row_lvec'] + 8 * li
        vec = const_ref[r:r + 8, :]                                    # f32 biases/LN
        bqkv = vec[0:1, 0:3 * d_model]
        bo = vec[1:2, 0:d_model]
        b1 = vec[2:3, 0:d_ff]
        b2 = vec[3:4, 0:d_model]
        ln1g = vec[4:5, 0:d_model]
        ln1b = vec[5:6, 0:d_model]
        ln2g = vec[6:7, 0:d_model]
        ln2b = vec[7:8, 0:d_model]

        # 1/sqrt(head_dim) is folded into Wq and bq at pack time.
        qkv = jnp.dot(h.astype(bf16), wqkv, preferred_element_type=f32) + bqkv
        q = qkv[:, 0:d_model]
        k = qkv[:, d_model:2 * d_model]
        v = qkv[:, 2 * d_model:3 * d_model]

        # all heads & all tokens at once: replicate q along sublanes and mask
        # each replica to its head's lanes -> one score matmul, one softmax.
        q_exp = jnp.concatenate([q] * n_head, axis=0) * head_mask      # (H*N, D)
        sc = jax.lax.dot_general(q_exp, k, (((1,), (1,)), ((), ())),
                                 preferred_element_type=f32)           # (H*N, N)
        sc = sc + neg_t
        sc = sc - jnp.max(sc, axis=-1, keepdims=True)
        p = jnp.exp(sc)
        p = p * pl.reciprocal(jnp.sum(p, axis=-1, keepdims=True), approx=True)

        av = jnp.dot(p, v, preferred_element_type=f32) * head_mask     # (H*N, D)
        attn = av[0:n]
        for hh in range(1, n_head):                   # head merge = sublane adds
            attn = attn + av[hh * n:(hh + 1) * n]
        attn = jnp.dot(attn.astype(bf16), wo, preferred_element_type=f32) + bo

        h1 = _layer_norm(h + attn, ln1g, ln1b)
        ff = jnp.maximum(
            jnp.dot(h1.astype(bf16), w1, preferred_element_type=f32) + b1, 0.0)
        ff = jnp.dot(ff.astype(bf16), w2, preferred_element_type=f32) + b2
        h = _layer_norm(h1 + ff, ln2g, ln2b)

    out_ref[...] = jnp.tanh(h)                        # (N, D)


# ---------------------------------------------------------------------------
# Wrapper
# ---------------------------------------------------------------------------
def att_fu_encode(packed, f4, f3, c4, c3, o1, o2, e1, e2):
    n = f4.shape[0]
    l = f4.shape[-1]
    # squeeze the singleton channel dim; a size-1 squeeze is a bitcast,
    # no separately dispatched HBM op in front of the kernel.
    sigs = [s.reshape(n, l) for s in (f4, f3, c4, c3, o1, o2, e1, e2)]

    kernel = functools.partial(
        att_fu_encode_kernel, n_chan=CHANNELS, seg_len=l, n_head=N_HEAD,
        n_layers=LAYER_NUM, d_model=D_MODEL, d_ff=D_FF)

    def full_spec(a):
        nd = a.ndim
        return pl.BlockSpec(a.shape, lambda *_: (0,) * nd)

    operands = (*sigs, packed['consts'], packed['weights'])
    out = pl.pallas_call(
        kernel,
        out_shape=jax.ShapeDtypeStruct((n, D_MODEL), jnp.float32),
        grid=(1,),                                    # everything VMEM-resident
        in_specs=[full_spec(a) for a in operands],
        out_specs=pl.BlockSpec((n, D_MODEL), lambda *_: (0, 0)),
        # single TensorCore on purpose: per-core work is sub-microsecond, so
        # sharding across v7x's 2 TCs would only add sync/launch overhead.
        compiler_params=pltpu.CompilerParams(
            dimension_semantics=("arbitrary",)),
    )(*operands)

    return out.reshape(n // SEQ_LENGTH, SEQ_LENGTH, D_MODEL)  # x.view(batch, Seq, -1)


# ---------------------------------------------------------------------------
# Parameter packing (done once, outside the kernel)
# ---------------------------------------------------------------------------
def pack_params(params, n_epochs=N_EPOCHS):
    C, L, D, H = CHANNELS, FEAT_LEN, D_MODEL, N_HEAD
    CL = C * L
    n_layers = len(params['layers'])
    lay = _layout(n_epochs, C, L, H, D, D_FF, n_layers)
    hd = D // H
    scale = 1.0 / math.sqrt(hd)

    # Fold the 1x1 modality-fusion convs + all-modality Linear (exact, linear).
    w_fuse = np.zeros((CL, 2 * L), np.float32)
    eeg_w = np.asarray(params['eeg_w']).reshape(-1)       # (6,)
    eog_w = np.asarray(params['eog_w']).reshape(-1)       # (2,)
    eye = np.eye(L, dtype=np.float32)
    for ci in range(EEG_NUM):
        w_fuse[ci * L:(ci + 1) * L, :L] = eye * eeg_w[ci]
    for ci in range(EOG_NUM):
        cc = EEG_NUM + ci
        w_fuse[cc * L:(cc + 1) * L, L:] = eye * eog_w[ci]
    b_fuse = np.concatenate([
        np.full((L,), float(params['eeg_b'][0, 0]), np.float32),
        np.full((L,), float(params['eog_b'][0, 0]), np.float32)])
    af_w = np.asarray(params['af_w'])                     # (2L, D)
    af_b = np.asarray(params['af_b']).reshape(-1)         # (D,)
    w_all = (w_fuse @ af_w).astype(np.float32)            # (C*L, D)
    b_all = (b_fuse @ af_w + af_b).astype(np.float32)     # (D,)

    # ---- f32 constants slab: masks + SRM/fusion scalars + per-layer bias/LN
    consts = np.zeros((lay['const_rows'], LANES), np.float32)
    for ci in range(C):                                   # segT (C, C*L) indicator
        consts[ci, ci * L:(ci + 1) * L] = 1.0
    qi = np.arange(n_epochs)[:, None] // SEQ_LENGTH       # block-diag sequence mask
    kj = np.arange(n_epochs)[None, :] // SEQ_LENGTH
    neg = np.where(qi == kj, 0.0, -1e30).astype(np.float32)
    consts[lay['row_neg']:lay['row_neg'] + lay['hn'], :n_epochs] = np.tile(neg, (H, 1))
    for hh in range(H):                                   # head lane-mask (H*N, D)
        r0 = lay['row_hmask'] + hh * n_epochs
        consts[r0:r0 + n_epochs, hh * hd:(hh + 1) * hd] = 1.0
    cfc = np.asarray(params['cfc_w'])                     # (2, C)
    consts[lay['row_misc'], :C] = cfc[0]
    consts[lay['row_misc'] + 1, :C] = cfc[1]
    consts[lay['row_misc'] + 2, :D] = b_all

    # ---- bf16 weights slab: fused fusion matmul + per-layer weight blocks --
    w = np.zeros((lay['w_rows'], LANES), np.float32)
    w[:CL, :D] = w_all
    for li, lp in enumerate(params['layers']):
        base = CL + li * lay['per_layer']
        wq = np.asarray(lp['wq']) * scale                 # fold attention scale
        w[base:base + D, :3 * D] = np.concatenate(
            [wq, np.asarray(lp['wk']), np.asarray(lp['wv'])], axis=1)
        w[base + D:base + 2 * D, :D] = np.asarray(lp['wo'])
        w[base + 2 * D:base + 3 * D, :D_FF] = np.asarray(lp['w1'])
        w[base + 3 * D:base + 3 * D + D_FF, :D] = np.asarray(lp['w2'])

        r = lay['row_lvec'] + 8 * li
        bq = np.asarray(lp['bq']).reshape(-1) * scale     # scale folded into bq too
        consts[r, :3 * D] = np.concatenate(
            [bq, np.asarray(lp['bk']).reshape(-1), np.asarray(lp['bv']).reshape(-1)])
        consts[r + 1, :D] = np.asarray(lp['bo']).reshape(-1)
        consts[r + 2, :D_FF] = np.asarray(lp['b1']).reshape(-1)
        consts[r + 3, :D] = np.asarray(lp['b2']).reshape(-1)
        consts[r + 4, :D] = np.asarray(lp['ln1_g']).reshape(-1)
        consts[r + 5, :D] = np.asarray(lp['ln1_b']).reshape(-1)
        consts[r + 6, :D] = np.asarray(lp['ln2_g']).reshape(-1)
        consts[r + 7, :D] = np.asarray(lp['ln2_b']).reshape(-1)

    return dict(consts=jnp.asarray(consts),
                weights=jnp.asarray(w).astype(jnp.bfloat16))


# ---------------------------------------------------------------------------
# Deterministic parameter init (PyTorch-shaped)
# ---------------------------------------------------------------------------
def init_params(key):
    def nrm(k, shape, scale=0.1):
        return scale * jax.random.normal(k, shape, dtype=jnp.float32)

    keys = jax.random.split(key, 10 + LAYER_NUM)
    params = dict(
        cfc_w=nrm(keys[0], (2, CHANNELS)),            # SRM CFC weight, (2, C)
        eeg_w=nrm(keys[1], (1, EEG_NUM, 1)),          # Conv1d(6,1,1) weight
        eeg_b=nrm(keys[2], (1, 1), 0.05),
        eog_w=nrm(keys[3], (1, EOG_NUM, 1)),          # Conv1d(2,1,1) weight
        eog_b=nrm(keys[4], (1, 1), 0.05),
        af_w=nrm(keys[5], (2 * FEAT_LEN, D_MODEL)),   # Linear(2L, d_model)
        af_b=nrm(keys[6], (1, D_MODEL)),
        layers=[],
    )
    for li in range(LAYER_NUM):
        lk = jax.random.split(keys[10 + li], 16)
        params['layers'].append(dict(
            wq=nrm(lk[0], (D_MODEL, D_MODEL)), bq=nrm(lk[1], (1, D_MODEL), 0.05),
            wk=nrm(lk[2], (D_MODEL, D_MODEL)), bk=nrm(lk[3], (1, D_MODEL), 0.05),
            wv=nrm(lk[4], (D_MODEL, D_MODEL)), bv=nrm(lk[5], (1, D_MODEL), 0.05),
            wo=nrm(lk[6], (D_MODEL, D_MODEL)), bo=nrm(lk[7], (1, D_MODEL), 0.05),
            ln1_g=1.0 + nrm(lk[8], (1, D_MODEL), 0.05),
            ln1_b=nrm(lk[9], (1, D_MODEL), 0.05),
            w1=nrm(lk[10], (D_MODEL, D_FF)), b1=nrm(lk[11], (1, D_FF), 0.05),
            w2=nrm(lk[12], (D_FF, D_MODEL)), b2=nrm(lk[13], (1, D_MODEL), 0.05),
            ln2_g=1.0 + nrm(lk[14], (1, D_MODEL), 0.05),
            ln2_b=nrm(lk[15], (1, D_MODEL), 0.05),
        ))
    return params


# ---------------------------------------------------------------------------
# Pure-JAX reference (unpacked, per-head / per-batch) for correctness check
# ---------------------------------------------------------------------------
def reference(params, *signals):
    x = jnp.concatenate(signals, axis=1)
    n, c, l = x.shape
    mean = x.mean(-1)
    std = jnp.sqrt(((x - mean[:, :, None]) ** 2).sum(-1) / (l - 1))
    z = mean * params['cfc_w'][0:1, :] + std * params['cfc_w'][1:2, :]
    g = jax.nn.sigmoid(z)
    xg = x * g[:, :, None]
    eeg = (xg[:, :EEG_NUM] * params['eeg_w']).sum(1) + params['eeg_b']
    eog = (xg[:, EEG_NUM:] * params['eog_w']).sum(1) + params['eog_b']
    feat = jnp.concatenate([eeg, eog], -1)
    h = feat @ params['af_w'] + params['af_b']
    h = h.reshape(n // SEQ_LENGTH, SEQ_LENGTH, -1)
    hd = D_MODEL // N_HEAD
    for lp in params['layers']:
        q = h @ lp['wq'] + lp['bq']
        k = h @ lp['wk'] + lp['bk']
        v = h @ lp['wv'] + lp['bv']
        outs = []
        for hh in range(N_HEAD):
            qh = q[..., hh * hd:(hh + 1) * hd]
            kh = k[..., hh * hd:(hh + 1) * hd]
            vh = v[..., hh * hd:(hh + 1) * hd]
            sc = jnp.einsum('bsd,btd->bst', qh, kh) / math.sqrt(hd)
            p = jax.nn.softmax(sc, axis=-1)
            outs.append(jnp.einsum('bst,btd->bsd', p, vh))
        attn = jnp.concatenate(outs, -1) @ lp['wo'] + lp['bo']
        h1 = _layer_norm(h + attn, lp['ln1_g'], lp['ln1_b'])
        ff = jnp.maximum(h1 @ lp['w1'] + lp['b1'], 0.0) @ lp['w2'] + lp['b2']
        h = _layer_norm(h1 + ff, lp['ln2_g'], lp['ln2_b'])
    return jnp.tanh(h)


if __name__ == "__main__":
    key = jax.random.PRNGKey(0)
    pkey, *skeys = jax.random.split(key, 9)
    params = init_params(pkey)
    # f4, f3, c4, c3, o1, o2, e1, e2 : each (batch*SeqLength, 1, L)
    signals = [jax.random.normal(k, (N_EPOCHS, 1, FEAT_LEN), jnp.float32)
               for k in skeys]

    packed = pack_params(params)
    out = att_fu_encode(packed, *signals)
    out = jax.block_until_ready(out)

    ref = reference(params, *signals)
    assert out.shape == (BATCH, SEQ_LENGTH, D_MODEL)
    assert bool(jnp.all(jnp.isfinite(out)))
    # tolerance covers bf16 MXU weights + the approximate softmax reciprocal
    assert np.allclose(np.asarray(out), np.asarray(ref), atol=3e-2, rtol=3e-2)
    print("KERNEL_OK")
</pallas_src>

<mosaic_0001>
module attributes {stable_mosaic.version = 11 : i64} {
  func.func @att_fu_encode_kernel(%arg0: i32, %arg1: memref<8x16xf32, #tpu.memory_space<vmem>>, %arg2: memref<8x16xf32, #tpu.memory_space<vmem>>, %arg3: memref<8x16xf32, #tpu.memory_space<vmem>>, %arg4: memref<8x16xf32, #tpu.memory_space<vmem>>, %arg5: memref<8x16xf32, #tpu.memory_space<vmem>>, %arg6: memref<8x16xf32, #tpu.memory_space<vmem>>, %arg7: memref<8x16xf32, #tpu.memory_space<vmem>>, %arg8: memref<8x16xf32, #tpu.memory_space<vmem>>, %arg9: memref<96x128xf32, #tpu.memory_space<vmem>>, %arg10: memref<448x128xbf16, #tpu.memory_space<vmem>>, %arg11: memref<8x32xf32, #tpu.memory_space<vmem>>) attributes {dimension_semantics = [#tpu.dimension_semantics<arbitrary>], iteration_bounds = array<i64: 1>, scalar_prefetch = 0 : i64, scratch_operands = 0 : i64, tpu.core_type = #tpu.core_type<tc>, window_params = [{pipeline_mode = #tpu.pipeline_mode<synchronous>, transform_indices = @transform_0, window_bounds = array<i64: 8, 16>}, {pipeline_mode = #tpu.pipeline_mode<synchronous>, transform_indices = @transform_1, window_bounds = array<i64: 8, 16>}, {pipeline_mode = #tpu.pipeline_mode<synchronous>, transform_indices = @transform_2, window_bounds = array<i64: 8, 16>}, {pipeline_mode = #tpu.pipeline_mode<synchronous>, transform_indices = @transform_3, window_bounds = array<i64: 8, 16>}, {pipeline_mode = #tpu.pipeline_mode<synchronous>, transform_indices = @transform_4, window_bounds = array<i64: 8, 16>}, {pipeline_mode = #tpu.pipeline_mode<synchronous>, transform_indices = @transform_5, window_bounds = array<i64: 8, 16>}, {pipeline_mode = #tpu.pipeline_mode<synchronous>, transform_indices = @transform_6, window_bounds = array<i64: 8, 16>}, {pipeline_mode = #tpu.pipeline_mode<synchronous>, transform_indices = @transform_7, window_bounds = array<i64: 8, 16>}, {pipeline_mode = #tpu.pipeline_mode<synchronous>, transform_indices = @transform_8, window_bounds = array<i64: 96, 128>}, {pipeline_mode = #tpu.pipeline_mode<synchronous>, transform_indices = @transform_9, window_bounds = array<i64: 448, 128>}, {pipeline_mode = #tpu.pipeline_mode<synchronous>, transform_indices = @transform_10, window_bounds = array<i64: 8, 32>}]} {
    %c0 = arith.constant 0 : index
    %c0_0 = arith.constant 0 : index
    %0 = vector.load %arg1[%c0, %c0_0] : memref<8x16xf32, #tpu.memory_space<vmem>>, vector<8x16xf32>
    %c0_1 = arith.constant 0 : index
    %c0_2 = arith.constant 0 : index
    %1 = vector.load %arg2[%c0_1, %c0_2] : memref<8x16xf32, #tpu.memory_space<vmem>>, vector<8x16xf32>
    %c0_3 = arith.constant 0 : index
    %c0_4 = arith.constant 0 : index
    %2 = vector.load %arg3[%c0_3, %c0_4] : memref<8x16xf32, #tpu.memory_space<vmem>>, vector<8x16xf32>
    %c0_5 = arith.constant 0 : index
    %c0_6 = arith.constant 0 : index
    %3 = vector.load %arg4[%c0_5, %c0_6] : memref<8x16xf32, #tpu.memory_space<vmem>>, vector<8x16xf32>
    %c0_7 = arith.constant 0 : index
    %c0_8 = arith.constant 0 : index
    %4 = vector.load %arg5[%c0_7, %c0_8] : memref<8x16xf32, #tpu.memory_space<vmem>>, vector<8x16xf32>
    %c0_9 = arith.constant 0 : index
    %c0_10 = arith.constant 0 : index
    %5 = vector.load %arg6[%c0_9, %c0_10] : memref<8x16xf32, #tpu.memory_space<vmem>>, vector<8x16xf32>
    %c0_11 = arith.constant 0 : index
    %c0_12 = arith.constant 0 : index
    %6 = vector.load %arg7[%c0_11, %c0_12] : memref<8x16xf32, #tpu.memory_space<vmem>>, vector<8x16xf32>
    %c0_13 = arith.constant 0 : index
    %c0_14 = arith.constant 0 : index
    %7 = vector.load %arg8[%c0_13, %c0_14] : memref<8x16xf32, #tpu.memory_space<vmem>>, vector<8x16xf32>
    %8 = tpu.concatenate %0, %1, %2, %3, %4, %5, %6, %7 in 1 : vector<8x16xf32>, vector<8x16xf32>, vector<8x16xf32>, vector<8x16xf32>, vector<8x16xf32>, vector<8x16xf32>, vector<8x16xf32>, vector<8x16xf32> -> vector<8x128xf32>
    %c0_15 = arith.constant 0 : index
    %c0_16 = arith.constant 0 : index
    %9 = vector.load %arg9[%c0_15, %c0_16] : memref<96x128xf32, #tpu.memory_space<vmem>>, vector<8x128xf32>
    %10 = arith.mulf %8, %8 : vector<8x128xf32>
    %11 = tpu.concatenate %8, %10 in 0 : vector<8x128xf32>, vector<8x128xf32> -> vector<16x128xf32>
    %cst = arith.constant dense<0.000000e+00> : vector<16x8xf32>
    %12 = tpu.matmul %11, %9, %cst {dimension_numbers = #tpu.dot_dimension_numbers<[1], [1], [0], [0], [0, 0, 1, 0], [], []>} : vector<16x128xf32>, vector<8x128xf32>, vector<16x8xf32> -> vector<16x8xf32>
    %13 = vector.extract_strided_slice %12 {offsets = [0, 0], sizes = [8, 8], strides = [1, 1]} : vector<16x8xf32> to vector<8x8xf32>
    %14 = vector.extract_strided_slice %12 {offsets = [8, 0], sizes = [8, 8], strides = [1, 1]} : vector<16x8xf32> to vector<8x8xf32>
    %cst_17 = arith.constant 6.250000e-02 : f32
    %15 = vector.broadcast %cst_17 : f32 to vector<8x8xf32>
    %16 = arith.mulf %13, %15 : vector<8x8xf32>
    %17 = arith.mulf %16, %13 : vector<8x8xf32>
    %18 = arith.subf %14, %17 : vector<8x8xf32>
    %cst_18 = arith.constant 0.0666666701 : f32
    %19 = vector.broadcast %cst_18 : f32 to vector<8x8xf32>
    %20 = arith.mulf %18, %19 : vector<8x8xf32>
    %cst_19 = arith.constant 0.000000e+00 : f32
    %21 = vector.broadcast %cst_19 : f32 to vector<8x8xf32>
    %22 = arith.maximumf %20, %21 : vector<8x8xf32>
    %23 = math.sqrt %22 : vector<8x8xf32>
    %c72 = arith.constant 72 : index
    %c0_20 = arith.constant 0 : index
    %24 = vector.load %arg9[%c72, %c0_20] : memref<96x128xf32, #tpu.memory_space<vmem>>, vector<8x128xf32>
    %25 = vector.extract_strided_slice %24 {offsets = [0, 0], sizes = [1, 8], strides = [1, 1]} : vector<8x128xf32> to vector<1x8xf32>
    %26 = vector.extract_strided_slice %24 {offsets = [1, 0], sizes = [1, 8], strides = [1, 1]} : vector<8x128xf32> to vector<1x8xf32>
    %27 = vector.extract_strided_slice %24 {offsets = [2, 0], sizes = [1, 32], strides = [1, 1]} : vector<8x128xf32> to vector<1x32xf32>
    %28 = vector.broadcast %25 : vector<1x8xf32> to vector<8x8xf32>
    %29 = arith.mulf %16, %28 : vector<8x8xf32>
    %30 = vector.broadcast %26 : vector<1x8xf32> to vector<8x8xf32>
    %31 = arith.mulf %23, %30 : vector<8x8xf32>
    %32 = arith.addf %29, %31 : vector<8x8xf32>
    %33 = arith.negf %32 : vector<8x8xf32>
    %34 = math.exp %33 : vector<8x8xf32>
    %cst_21 = arith.constant 1.000000e+00 : f32
    %35 = vector.broadcast %cst_21 : f32 to vector<8x8xf32>
    %36 = arith.addf %35, %34 : vector<8x8xf32>
    %37 = arith.divf %35, %36 : vector<8x8xf32>
    %cst_22 = arith.constant dense<0.000000e+00> : vector<8x128xf32>
    %38 = tpu.matmul %37, %9, %cst_22 {dimension_numbers = #tpu.dot_dimension_numbers<[1], [0], [0], [1], [0, 0, 1, 1], [], []>} : vector<8x8xf32>, vector<8x128xf32>, vector<8x128xf32> -> vector<8x128xf32>
    %39 = arith.mulf %8, %38 : vector<8x128xf32>
    %c0_23 = arith.constant 0 : index
    %c0_24 = arith.constant 0 : index
    %40 = vector.load %arg10[%c0_23, %c0_24] : memref<448x128xbf16, #tpu.memory_space<vmem>>, vector<128x128xbf16>
    %41 = vector.extract_strided_slice %40 {offsets = [0, 0], sizes = [128, 32], strides = [1, 1]} : vector<128x128xbf16> to vector<128x32xbf16>
    %42 = arith.truncf %39 : vector<8x128xf32> to vector<8x128xbf16>
    %cst_25 = arith.constant dense<0.000000e+00> : vector<8x32xf32>
    %43 = tpu.matmul %42, %41, %cst_25 {dimension_numbers = #tpu.dot_dimension_numbers<[1], [0], [0], [1], [0, 0, 1, 1], [], []>} : vector<8x128xbf16>, vector<128x32xbf16>, vector<8x32xf32> -> vector<8x32xf32>
    %44 = vector.broadcast %27 : vector<1x32xf32> to vector<8x32xf32>
    %45 = arith.addf %43, %44 : vector<8x32xf32>
    %c8 = arith.constant 8 : index
    %c0_26 = arith.constant 0 : index
    %46 = vector.load %arg9[%c8, %c0_26] : memref<96x128xf32, #tpu.memory_space<vmem>>, vector<32x128xf32>
    %47 = vector.extract_strided_slice %46 {offsets = [0, 0], sizes = [32, 8], strides = [1, 1]} : vector<32x128xf32> to vector<32x8xf32>
    %c40 = arith.constant 40 : index
    %c0_27 = arith.constant 0 : index
    %48 = vector.load %arg9[%c40, %c0_27] : memref<96x128xf32, #tpu.memory_space<vmem>>, vector<32x128xf32>
    %49 = vector.extract_strided_slice %48 {offsets = [0, 0], sizes = [32, 32], strides = [1, 1]} : vector<32x128xf32> to vector<32x32xf32>
    %c128 = arith.constant 128 : index
    %c0_28 = arith.constant 0 : index
    %50 = vector.load %arg10[%c128, %c0_28] : memref<448x128xbf16, #tpu.memory_space<vmem>>, vector<160x128xbf16>
    %51 = vector.extract_strided_slice %50 {offsets = [0, 0], sizes = [32, 96], strides = [1, 1]} : vector<160x128xbf16> to vector<32x96xbf16>
    %52 = vector.extract_strided_slice %50 {offsets = [32, 0], sizes = [32, 32], strides = [1, 1]} : vector<160x128xbf16> to vector<32x32xbf16>
    %53 = vector.extract_strided_slice %50 {offsets = [64, 0], sizes = [32, 64], strides = [1, 1]} : vector<160x128xbf16> to vector<32x64xbf16>
    %54 = vector.extract_strided_slice %50 {offsets = [96, 0], sizes = [64, 32], strides = [1, 1]} : vector<160x128xbf16> to vector<64x32xbf16>
    %c80 = arith.constant 80 : index
    %c0_29 = arith.constant 0 : index
    %55 = vector.load %arg9[%c80, %c0_29] : memref<96x128xf32, #tpu.memory_space<vmem>>, vector<8x128xf32>
    %56 = vector.extract_strided_slice %55 {offsets = [0, 0], sizes = [1, 96], strides = [1, 1]} : vector<8x128xf32> to vector<1x96xf32>
    %57 = vector.extract_strided_slice %55 {offsets = [1, 0], sizes = [1, 32], strides = [1, 1]} : vector<8x128xf32> to vector<1x32xf32>
    %58 = vector.extract_strided_slice %55 {offsets = [2, 0], sizes = [1, 64], strides = [1, 1]} : vector<8x128xf32> to vector<1x64xf32>
    %59 = vector.extract_strided_slice %55 {offsets = [3, 0], sizes = [1, 32], strides = [1, 1]} : vector<8x128xf32> to vector<1x32xf32>
    %60 = vector.extract_strided_slice %55 {offsets = [4, 0], sizes = [1, 32], strides = [1, 1]} : vector<8x128xf32> to vector<1x32xf32>
    %61 = vector.extract_strided_slice %55 {offsets = [5, 0], sizes = [1, 32], strides = [1, 1]} : vector<8x128xf32> to vector<1x32xf32>
    %62 = vector.extract_strided_slice %55 {offsets = [6, 0], sizes = [1, 32], strides = [1, 1]} : vector<8x128xf32> to vector<1x32xf32>
    %63 = vector.extract_strided_slice %55 {offsets = [7, 0], sizes = [1, 32], strides = [1, 1]} : vector<8x128xf32> to vector<1x32xf32>
    %64 = arith.truncf %45 : vector<8x32xf32> to vector<8x32xbf16>
    %cst_30 = arith.constant dense<0.000000e+00> : vector<8x96xf32>
    %65 = tpu.matmul %64, %51, %cst_30 {dimension_numbers = #tpu.dot_dimension_numbers<[1], [0], [0], [1], [0, 0, 1, 1], [], []>} : vector<8x32xbf16>, vector<32x96xbf16>, vector<8x96xf32> -> vector<8x96xf32>
    %66 = vector.broadcast %56 : vector<1x96xf32> to vector<8x96xf32>
    %67 = arith.addf %65, %66 : vector<8x96xf32>
    %68 = vector.extract_strided_slice %67 {offsets = [0, 0], sizes = [8, 32], strides = [1, 1]} : vector<8x96xf32> to vector<8x32xf32>
    %69 = vector.extract_strided_slice %67 {offsets = [0, 32], sizes = [8, 32], strides = [1, 1]} : vector<8x96xf32> to vector<8x32xf32>
    %70 = vector.extract_strided_slice %67 {offsets = [0, 64], sizes = [8, 32], strides = [1, 1]} : vector<8x96xf32> to vector<8x32xf32>
    %71 = tpu.concatenate %68, %68, %68, %68 in 0 : vector<8x32xf32>, vector<8x32xf32>, vector<8x32xf32>, vector<8x32xf32> -> vector<32x32xf32>
    %72 = arith.mulf %71, %49 : vector<32x32xf32>
    %cst_31 = arith.constant dense<0.000000e+00> : vector<32x8xf32>
    %73 = tpu.matmul %72, %69, %cst_31 {dimension_numbers = #tpu.dot_dimension_numbers<[1], [1], [0], [0], [0, 0, 1, 0], [], []>} : vector<32x32xf32>, vector<8x32xf32>, vector<32x8xf32> -> vector<32x8xf32>
    %74 = arith.addf %73, %47 : vector<32x8xf32>
    %cst_32 = arith.constant dense<0xFF800000> : vector<32xf32>
    %75 = vector.multi_reduction <maximumf>, %74, %cst_32 [1] : vector<32x8xf32> to vector<32xf32>
    %76 = vector.shape_cast %75 : vector<32xf32> to vector<32x1xf32>
    %77 = vector.broadcast %76 : vector<32x1xf32> to vector<32x8xf32>
    %78 = arith.subf %74, %77 : vector<32x8xf32>
    %79 = math.exp %78 : vector<32x8xf32>
    %cst_33 = arith.constant dense<0.000000e+00> : vector<32xf32>
    %80 = vector.multi_reduction <add>, %79, %cst_33 [1] : vector<32x8xf32> to vector<32xf32>
    %81 = vector.shape_cast %80 : vector<32xf32> to vector<32x1xf32>
    %82 = tpu.reciprocal %81 {approx = true} : vector<32x1xf32> -> vector<32x1xf32>
    %83 = vector.broadcast %82 : vector<32x1xf32> to vector<32x8xf32>
    %84 = arith.mulf %79, %83 : vector<32x8xf32>
    %cst_34 = arith.constant dense<0.000000e+00> : vector<32x32xf32>
    %85 = tpu.matmul %84, %70, %cst_34 {dimension_numbers = #tpu.dot_dimension_numbers<[1], [0], [0], [1], [0, 0, 1, 1], [], []>} : vector<32x8xf32>, vector<8x32xf32>, vector<32x32xf32> -> vector<32x32xf32>
    %86 = arith.mulf %85, %49 : vector<32x32xf32>
    %87 = vector.extract_strided_slice %86 {offsets = [0, 0], sizes = [8, 32], strides = [1, 1]} : vector<32x32xf32> to vector<8x32xf32>
    %88 = vector.extract_strided_slice %86 {offsets = [8, 0], sizes = [8, 32], strides = [1, 1]} : vector<32x32xf32> to vector<8x32xf32>
    %89 = arith.addf %87, %88 : vector<8x32xf32>
    %90 = vector.extract_strided_slice %86 {offsets = [16, 0], sizes = [8, 32], strides = [1, 1]} : vector<32x32xf32> to vector<8x32xf32>
    %91 = arith.addf %89, %90 : vector<8x32xf32>
    %92 = vector.extract_strided_slice %86 {offsets = [24, 0], sizes = [8, 32], strides = [1, 1]} : vector<32x32xf32> to vector<8x32xf32>
    %93 = arith.addf %91, %92 : vector<8x32xf32>
    %94 = arith.truncf %93 : vector<8x32xf32> to vector<8x32xbf16>
    %cst_35 = arith.constant dense<0.000000e+00> : vector<8x32xf32>
    %95 = tpu.matmul %94, %52, %cst_35 {dimension_numbers = #tpu.dot_dimension_numbers<[1], [0], [0], [1], [0, 0, 1, 1], [], []>} : vector<8x32xbf16>, vector<32x32xbf16>, vector<8x32xf32> -> vector<8x32xf32>
    %96 = vector.broadcast %57 : vector<1x32xf32> to vector<8x32xf32>
    %97 = arith.addf %95, %96 : vector<8x32xf32>
    %98 = arith.addf %45, %97 : vector<8x32xf32>
    %cst_36 = arith.constant dense<0.000000e+00> : vector<8xf32>
    %99 = vector.multi_reduction <add>, %98, %cst_36 [1] : vector<8x32xf32> to vector<8xf32>
    %100 = vector.shape_cast %99 : vector<8xf32> to vector<8x1xf32>
    %cst_37 = arith.constant 3.200000e+01 : f32
    %101 = vector.broadcast %cst_37 : f32 to vector<8x1xf32>
    %102 = arith.divf %100, %101 : vector<8x1xf32>
    %103 = vector.broadcast %102 : vector<8x1xf32> to vector<8x32xf32>
    %104 = arith.subf %98, %103 : vector<8x32xf32>
    %105 = arith.mulf %104, %104 : vector<8x32xf32>
    %cst_38 = arith.constant dense<0.000000e+00> : vector<8xf32>
    %106 = vector.multi_reduction <add>, %105, %cst_38 [1] : vector<8x32xf32> to vector<8xf32>
    %107 = vector.shape_cast %106 : vector<8xf32> to vector<8x1xf32>
    %cst_39 = arith.constant 3.200000e+01 : f32
    %108 = vector.broadcast %cst_39 : f32 to vector<8x1xf32>
    %109 = arith.divf %107, %108 : vector<8x1xf32>
    %110 = vector.broadcast %102 : vector<8x1xf32> to vector<8x32xf32>
    %111 = arith.subf %98, %110 : vector<8x32xf32>
    %cst_40 = arith.constant 9.99999974E-6 : f32
    %112 = vector.broadcast %cst_40 : f32 to vector<8x1xf32>
    %113 = arith.addf %109, %112 : vector<8x1xf32>
    %114 = math.rsqrt %113 : vector<8x1xf32>
    %115 = vector.broadcast %114 : vector<8x1xf32> to vector<8x32xf32>
    %116 = arith.mulf %111, %115 : vector<8x32xf32>
    %117 = vector.broadcast %60 : vector<1x32xf32> to vector<8x32xf32>
    %118 = arith.mulf %116, %117 : vector<8x32xf32>
    %119 = vector.broadcast %61 : vector<1x32xf32> to vector<8x32xf32>
    %120 = arith.addf %118, %119 : vector<8x32xf32>
    %121 = arith.truncf %120 : vector<8x32xf32> to vector<8x32xbf16>
    %cst_41 = arith.constant dense<0.000000e+00> : vector<8x64xf32>
    %122 = tpu.matmul %121, %53, %cst_41 {dimension_numbers = #tpu.dot_dimension_numbers<[1], [0], [0], [1], [0, 0, 1, 1], [], []>} : vector<8x32xbf16>, vector<32x64xbf16>, vector<8x64xf32> -> vector<8x64xf32>
    %123 = vector.broadcast %58 : vector<1x64xf32> to vector<8x64xf32>
    %124 = arith.addf %122, %123 : vector<8x64xf32>
    %cst_42 = arith.constant 0.000000e+00 : f32
    %125 = vector.broadcast %cst_42 : f32 to vector<8x64xf32>
    %126 = arith.maximumf %124, %125 : vector<8x64xf32>
    %127 = arith.truncf %126 : vector<8x64xf32> to vector<8x64xbf16>
    %cst_43 = arith.constant dense<0.000000e+00> : vector<8x32xf32>
    %128 = tpu.matmul %127, %54, %cst_43 {dimension_numbers = #tpu.dot_dimension_numbers<[1], [0], [0], [1], [0, 0, 1, 1], [], []>} : vector<8x64xbf16>, vector<64x32xbf16>, vector<8x32xf32> -> vector<8x32xf32>
    %129 = vector.broadcast %59 : vector<1x32xf32> to vector<8x32xf32>
    %130 = arith.addf %128, %129 : vector<8x32xf32>
    %131 = arith.addf %120, %130 : vector<8x32xf32>
    %cst_44 = arith.constant dense<0.000000e+00> : vector<8xf32>
    %132 = vector.multi_reduction <add>, %131, %cst_44 [1] : vector<8x32xf32> to vector<8xf32>
    %133 = vector.shape_cast %132 : vector<8xf32> to vector<8x1xf32>
    %cst_45 = arith.constant 3.200000e+01 : f32
    %134 = vector.broadcast %cst_45 : f32 to vector<8x1xf32>
    %135 = arith.divf %133, %134 : vector<8x1xf32>
    %136 = vector.broadcast %135 : vector<8x1xf32> to vector<8x32xf32>
    %137 = arith.subf %131, %136 : vector<8x32xf32>
    %138 = arith.mulf %137, %137 : vector<8x32xf32>
    %cst_46 = arith.constant dense<0.000000e+00> : vector<8xf32>
    %139 = vector.multi_reduction <add>, %138, %cst_46 [1] : vector<8x32xf32> to vector<8xf32>
    %140 = vector.shape_cast %139 : vector<8xf32> to vector<8x1xf32>
    %cst_47 = arith.constant 3.200000e+01 : f32
    %141 = vector.broadcast %cst_47 : f32 to vector<8x1xf32>
    %142 = arith.divf %140, %141 : vector<8x1xf32>
    %143 = vector.broadcast %135 : vector<8x1xf32> to vector<8x32xf32>
    %144 = arith.subf %131, %143 : vector<8x32xf32>
    %cst_48 = arith.constant 9.99999974E-6 : f32
    %145 = vector.broadcast %cst_48 : f32 to vector<8x1xf32>
    %146 = arith.addf %142, %145 : vector<8x1xf32>
    %147 = math.rsqrt %146 : vector<8x1xf32>
    %148 = vector.broadcast %147 : vector<8x1xf32> to vector<8x32xf32>
    %149 = arith.mulf %144, %148 : vector<8x32xf32>
    %150 = vector.broadcast %62 : vector<1x32xf32> to vector<8x32xf32>
    %151 = arith.mulf %149, %150 : vector<8x32xf32>
    %152 = vector.broadcast %63 : vector<1x32xf32> to vector<8x32xf32>
    %153 = arith.addf %151, %152 : vector<8x32xf32>
    %c288 = arith.constant 288 : index
    %c0_49 = arith.constant 0 : index
    %154 = vector.load %arg10[%c288, %c0_49] : memref<448x128xbf16, #tpu.memory_space<vmem>>, vector<160x128xbf16>
    %155 = vector.extract_strided_slice %154 {offsets = [0, 0], sizes = [32, 96], strides = [1, 1]} : vector<160x128xbf16> to vector<32x96xbf16>
    %156 = vector.extract_strided_slice %154 {offsets = [32, 0], sizes = [32, 32], strides = [1, 1]} : vector<160x128xbf16> to vector<32x32xbf16>
    %157 = vector.extract_strided_slice %154 {offsets = [64, 0], sizes = [32, 64], strides = [1, 1]} : vector<160x128xbf16> to vector<32x64xbf16>
    %158 = vector.extract_strided_slice %154 {offsets = [96, 0], sizes = [64, 32], strides = [1, 1]} : vector<160x128xbf16> to vector<64x32xbf16>
    %c88 = arith.constant 88 : index
    %c0_50 = arith.constant 0 : index
    %159 = vector.load %arg9[%c88, %c0_50] : memref<96x128xf32, #tpu.memory_space<vmem>>, vector<8x128xf32>
    %160 = vector.extract_strided_slice %159 {offsets = [0, 0], sizes = [1, 96], strides = [1, 1]} : vector<8x128xf32> to vector<1x96xf32>
    %161 = vector.extract_strided_slice %159 {offsets = [1, 0], sizes = [1, 32], strides = [1, 1]} : vector<8x128xf32> to vector<1x32xf32>
    %162 = vector.extract_strided_slice %159 {offsets = [2, 0], sizes = [1, 64], strides = [1, 1]} : vector<8x128xf32> to vector<1x64xf32>
    %163 = vector.extract_strided_slice %159 {offsets = [3, 0], sizes = [1, 32], strides = [1, 1]} : vector<8x128xf32> to vector<1x32xf32>
    %164 = vector.extract_strided_slice %159 {offsets = [4, 0], sizes = [1, 32], strides = [1, 1]} : vector<8x128xf32> to vector<1x32xf32>
    %165 = vector.extract_strided_slice %159 {offsets = [5, 0], sizes = [1, 32], strides = [1, 1]} : vector<8x128xf32> to vector<1x32xf32>
    %166 = vector.extract_strided_slice %159 {offsets = [6, 0], sizes = [1, 32], strides = [1, 1]} : vector<8x128xf32> to vector<1x32xf32>
    %167 = vector.extract_strided_slice %159 {offsets = [7, 0], sizes = [1, 32], strides = [1, 1]} : vector<8x128xf32> to vector<1x32xf32>
    %168 = arith.truncf %153 : vector<8x32xf32> to vector<8x32xbf16>
    %cst_51 = arith.constant dense<0.000000e+00> : vector<8x96xf32>
    %169 = tpu.matmul %168, %155, %cst_51 {dimension_numbers = #tpu.dot_dimension_numbers<[1], [0], [0], [1], [0, 0, 1, 1], [], []>} : vector<8x32xbf16>, vector<32x96xbf16>, vector<8x96xf32> -> vector<8x96xf32>
    %170 = vector.broadcast %160 : vector<1x96xf32> to vector<8x96xf32>
    %171 = arith.addf %169, %170 : vector<8x96xf32>
    %172 = vector.extract_strided_slice %171 {offsets = [0, 0], sizes = [8, 32], strides = [1, 1]} : vector<8x96xf32> to vector<8x32xf32>
    %173 = vector.extract_strided_slice %171 {offsets = [0, 32], sizes = [8, 32], strides = [1, 1]} : vector<8x96xf32> to vector<8x32xf32>
    %174 = vector.extract_strided_slice %171 {offsets = [0, 64], sizes = [8, 32], strides = [1, 1]} : vector<8x96xf32> to vector<8x32xf32>
    %175 = tpu.concatenate %172, %172, %172, %172 in 0 : vector<8x32xf32>, vector<8x32xf32>, vector<8x32xf32>, vector<8x32xf32> -> vector<32x32xf32>
    %176 = arith.mulf %175, %49 : vector<32x32xf32>
    %cst_52 = arith.constant dense<0.000000e+00> : vector<32x8xf32>
    %177 = tpu.matmul %176, %173, %cst_52 {dimension_numbers = #tpu.dot_dimension_numbers<[1], [1], [0], [0], [0, 0, 1, 0], [], []>} : vector<32x32xf32>, vector<8x32xf32>, vector<32x8xf32> -> vector<32x8xf32>
    %178 = arith.addf %177, %47 : vector<32x8xf32>
    %cst_53 = arith.constant dense<0xFF800000> : vector<32xf32>
    %179 = vector.multi_reduction <maximumf>, %178, %cst_53 [1] : vector<32x8xf32> to vector<32xf32>
    %180 = vector.shape_cast %179 : vector<32xf32> to vector<32x1xf32>
    %181 = vector.broadcast %180 : vector<32x1xf32> to vector<32x8xf32>
    %182 = arith.subf %178, %181 : vector<32x8xf32>
    %183 = math.exp %182 : vector<32x8xf32>
    %cst_54 = arith.constant dense<0.000000e+00> : vector<32xf32>
    %184 = vector.multi_reduction <add>, %183, %cst_54 [1] : vector<32x8xf32> to vector<32xf32>
    %185 = vector.shape_cast %184 : vector<32xf32> to vector<32x1xf32>
    %186 = tpu.reciprocal %185 {approx = true} : vector<32x1xf32> -> vector<32x1xf32>
    %187 = vector.broadcast %186 : vector<32x1xf32> to vector<32x8xf32>
    %188 = arith.mulf %183, %187 : vector<32x8xf32>
    %cst_55 = arith.constant dense<0.000000e+00> : vector<32x32xf32>
    %189 = tpu.matmul %188, %174, %cst_55 {dimension_numbers = #tpu.dot_dimension_numbers<[1], [0], [0], [1], [0, 0, 1, 1], [], []>} : vector<32x8xf32>, vector<8x32xf32>, vector<32x32xf32> -> vector<32x32xf32>
    %190 = arith.mulf %189, %49 : vector<32x32xf32>
    %191 = vector.extract_strided_slice %190 {offsets = [0, 0], sizes = [8, 32], strides = [1, 1]} : vector<32x32xf32> to vector<8x32xf32>
    %192 = vector.extract_strided_slice %190 {offsets = [8, 0], sizes = [8, 32], strides = [1, 1]} : vector<32x32xf32> to vector<8x32xf32>
    %193 = arith.addf %191, %192 : vector<8x32xf32>
    %194 = vector.extract_strided_slice %190 {offsets = [16, 0], sizes = [8, 32], strides = [1, 1]} : vector<32x32xf32> to vector<8x32xf32>
    %195 = arith.addf %193, %194 : vector<8x32xf32>
    %196 = vector.extract_strided_slice %190 {offsets = [24, 0], sizes = [8, 32], strides = [1, 1]} : vector<32x32xf32> to vector<8x32xf32>
    %197 = arith.addf %195, %196 : vector<8x32xf32>
    %198 = arith.truncf %197 : vector<8x32xf32> to vector<8x32xbf16>
    %cst_56 = arith.constant dense<0.000000e+00> : vector<8x32xf32>
    %199 = tpu.matmul %198, %156, %cst_56 {dimension_numbers = #tpu.dot_dimension_numbers<[1], [0], [0], [1], [0, 0, 1, 1], [], []>} : vector<8x32xbf16>, vector<32x32xbf16>, vector<8x32xf32> -> vector<8x32xf32>
    %200 = vector.broadcast %161 : vector<1x32xf32> to vector<8x32xf32>
    %201 = arith.addf %199, %200 : vector<8x32xf32>
    %202 = arith.addf %153, %201 : vector<8x32xf32>
    %cst_57 = arith.constant dense<0.000000e+00> : vector<8xf32>
    %203 = vector.multi_reduction <add>, %202, %cst_57 [1] : vector<8x32xf32> to vector<8xf32>
    %204 = vector.shape_cast %203 : vector<8xf32> to vector<8x1xf32>
    %cst_58 = arith.constant 3.200000e+01 : f32
    %205 = vector.broadcast %cst_58 : f32 to vector<8x1xf32>
    %206 = arith.divf %204, %205 : vector<8x1xf32>
    %207 = vector.broadcast %206 : vector<8x1xf32> to vector<8x32xf32>
    %208 = arith.subf %202, %207 : vector<8x32xf32>
    %209 = arith.mulf %208, %208 : vector<8x32xf32>
    %cst_59 = arith.constant dense<0.000000e+00> : vector<8xf32>
    %210 = vector.multi_reduction <add>, %209, %cst_59 [1] : vector<8x32xf32> to vector<8xf32>
    %211 = vector.shape_cast %210 : vector<8xf32> to vector<8x1xf32>
    %cst_60 = arith.constant 3.200000e+01 : f32
    %212 = vector.broadcast %cst_60 : f32 to vector<8x1xf32>
    %213 = arith.divf %211, %212 : vector<8x1xf32>
    %214 = vector.broadcast %206 : vector<8x1xf32> to vector<8x32xf32>
    %215 = arith.subf %202, %214 : vector<8x32xf32>
    %cst_61 = arith.constant 9.99999974E-6 : f32
    %216 = vector.broadcast %cst_61 : f32 to vector<8x1xf32>
    %217 = arith.addf %213, %216 : vector<8x1xf32>
    %218 = math.rsqrt %217 : vector<8x1xf32>
    %219 = vector.broadcast %218 : vector<8x1xf32> to vector<8x32xf32>
    %220 = arith.mulf %215, %219 : vector<8x32xf32>
    %221 = vector.broadcast %164 : vector<1x32xf32> to vector<8x32xf32>
    %222 = arith.mulf %220, %221 : vector<8x32xf32>
    %223 = vector.broadcast %165 : vector<1x32xf32> to vector<8x32xf32>
    %224 = arith.addf %222, %223 : vector<8x32xf32>
    %225 = arith.truncf %224 : vector<8x32xf32> to vector<8x32xbf16>
    %cst_62 = arith.constant dense<0.000000e+00> : vector<8x64xf32>
    %226 = tpu.matmul %225, %157, %cst_62 {dimension_numbers = #tpu.dot_dimension_numbers<[1], [0], [0], [1], [0, 0, 1, 1], [], []>} : vector<8x32xbf16>, vector<32x64xbf16>, vector<8x64xf32> -> vector<8x64xf32>
    %227 = vector.broadcast %162 : vector<1x64xf32> to vector<8x64xf32>
    %228 = arith.addf %226, %227 : vector<8x64xf32>
    %cst_63 = arith.constant 0.000000e+00 : f32
    %229 = vector.broadcast %cst_63 : f32 to vector<8x64xf32>
    %230 = arith.maximumf %228, %229 : vector<8x64xf32>
    %231 = arith.truncf %230 : vector<8x64xf32> to vector<8x64xbf16>
    %cst_64 = arith.constant dense<0.000000e+00> : vector<8x32xf32>
    %232 = tpu.matmul %231, %158, %cst_64 {dimension_numbers = #tpu.dot_dimension_numbers<[1], [0], [0], [1], [0, 0, 1, 1], [], []>} : vector<8x64xbf16>, vector<64x32xbf16>, vector<8x32xf32> -> vector<8x32xf32>
    %233 = vector.broadcast %163 : vector<1x32xf32> to vector<8x32xf32>
    %234 = arith.addf %232, %233 : vector<8x32xf32>
    %235 = arith.addf %224, %234 : vector<8x32xf32>
    %cst_65 = arith.constant dense<0.000000e+00> : vector<8xf32>
    %236 = vector.multi_reduction <add>, %235, %cst_65 [1] : vector<8x32xf32> to vector<8xf32>
    %237 = vector.shape_cast %236 : vector<8xf32> to vector<8x1xf32>
    %cst_66 = arith.constant 3.200000e+01 : f32
    %238 = vector.broadcast %cst_66 : f32 to vector<8x1xf32>
    %239 = arith.divf %237, %238 : vector<8x1xf32>
    %240 = vector.broadcast %239 : vector<8x1xf32> to vector<8x32xf32>
    %241 = arith.subf %235, %240 : vector<8x32xf32>
    %242 = arith.mulf %241, %241 : vector<8x32xf32>
    %cst_67 = arith.constant dense<0.000000e+00> : vector<8xf32>
    %243 = vector.multi_reduction <add>, %242, %cst_67 [1] : vector<8x32xf32> to vector<8xf32>
    %244 = vector.shape_cast %243 : vector<8xf32> to vector<8x1xf32>
    %cst_68 = arith.constant 3.200000e+01 : f32
    %245 = vector.broadcast %cst_68 : f32 to vector<8x1xf32>
    %246 = arith.divf %244, %245 : vector<8x1xf32>
    %247 = vector.broadcast %239 : vector<8x1xf32> to vector<8x32xf32>
    %248 = arith.subf %235, %247 : vector<8x32xf32>
    %cst_69 = arith.constant 9.99999974E-6 : f32
    %249 = vector.broadcast %cst_69 : f32 to vector<8x1xf32>
    %250 = arith.addf %246, %249 : vector<8x1xf32>
    %251 = math.rsqrt %250 : vector<8x1xf32>
    %252 = vector.broadcast %251 : vector<8x1xf32> to vector<8x32xf32>
    %253 = arith.mulf %248, %252 : vector<8x32xf32>
    %254 = vector.broadcast %166 : vector<1x32xf32> to vector<8x32xf32>
    %255 = arith.mulf %253, %254 : vector<8x32xf32>
    %256 = vector.broadcast %167 : vector<1x32xf32> to vector<8x32xf32>
    %257 = arith.addf %255, %256 : vector<8x32xf32>
    %258 = math.tanh %257 : vector<8x32xf32>
    %c0_70 = arith.constant 0 : index
    %c0_71 = arith.constant 0 : index
    %259 = vector.load %arg11[%c0_70, %c0_71] : memref<8x32xf32, #tpu.memory_space<vmem>>, vector<8x32xf32>
    tpu.vector_store %arg11[%c0_70, %c0_71], %258 {strides = array<i32>} : memref<8x32xf32, #tpu.memory_space<vmem>>, vector<8x32xf32>,
    return
  }
  func.func @transform_0(%arg0: i32) -> (i32, i32) {
    %c0_i32 = arith.constant 0 : i32
    %c0_i32_0 = arith.constant 0 : i32
    %c0_i32_1 = arith.constant 0 : i32
    return %c0_i32, %c0_i32_0 : i32, i32
  }
  func.func @transform_1(%arg0: i32) -> (i32, i32) {
    %c0_i32 = arith.constant 0 : i32
    %c0_i32_0 = arith.constant 0 : i32
    %c0_i32_1 = arith.constant 0 : i32
    return %c0_i32, %c0_i32_0 : i32, i32
  }
  func.func @transform_2(%arg0: i32) -> (i32, i32) {
    %c0_i32 = arith.constant 0 : i32
    %c0_i32_0 = arith.constant 0 : i32
    %c0_i32_1 = arith.constant 0 : i32
    return %c0_i32, %c0_i32_0 : i32, i32
  }
  func.func @transform_3(%arg0: i32) -> (i32, i32) {
    %c0_i32 = arith.constant 0 : i32
    %c0_i32_0 = arith.constant 0 : i32
    %c0_i32_1 = arith.constant 0 : i32
    return %c0_i32, %c0_i32_0 : i32, i32
  }
  func.func @transform_4(%arg0: i32) -> (i32, i32) {
    %c0_i32 = arith.constant 0 : i32
    %c0_i32_0 = arith.constant 0 : i32
    %c0_i32_1 = arith.constant 0 : i32
    return %c0_i32, %c0_i32_0 : i32, i32
  }
  func.func @transform_5(%arg0: i32) -> (i32, i32) {
    %c0_i32 = arith.constant 0 : i32
    %c0_i32_0 = arith.constant 0 : i32
    %c0_i32_1 = arith.constant 0 : i32
    return %c0_i32, %c0_i32_0 : i32, i32
  }
  func.func @transform_6(%arg0: i32) -> (i32, i32) {
    %c0_i32 = arith.constant 0 : i32
    %c0_i32_0 = arith.constant 0 : i32
    %c0_i32_1 = arith.constant 0 : i32
    return %c0_i32, %c0_i32_0 : i32, i32
  }
  func.func @transform_7(%arg0: i32) -> (i32, i32) {
    %c0_i32 = arith.constant 0 : i32
    %c0_i32_0 = arith.constant 0 : i32
    %c0_i32_1 = arith.constant 0 : i32
    return %c0_i32, %c0_i32_0 : i32, i32
  }
  func.func @transform_8(%arg0: i32) -> (i32, i32) {
    %c0_i32 = arith.constant 0 : i32
    %c0_i32_0 = arith.constant 0 : i32
    %c0_i32_1 = arith.constant 0 : i32
    return %c0_i32, %c0_i32_0 : i32, i32
  }
  func.func @transform_9(%arg0: i32) -> (i32, i32) {
    %c0_i32 = arith.constant 0 : i32
    %c0_i32_0 = arith.constant 0 : i32
    %c0_i32_1 = arith.constant 0 : i32
    return %c0_i32, %c0_i32_0 : i32, i32
  }
  func.func @transform_10(%arg0: i32) -> (i32, i32) {
    %c0_i32 = arith.constant 0 : i32
    %c0_i32_0 = arith.constant 0 : i32
    %c0_i32_1 = arith.constant 0 : i32
    return %c0_i32, %c0_i32_0 : i32, i32
  }
}

</mosaic_0001>

<bundles_post_ra>
// kernel: tpu_custom_call.1
= control target key start
LH: loop header
LB: loop body
LE: loop exit
PB: predicated region body
PF: predicated region fallthrough
CT: control target
= control target key end

     0   :  { %15 = vsyncpa [#allocation3], 0  ;;  %s1919_s0 = inlined_call_operand.hbm [shape: f32[8,16], index: 0, kind: input, shape index: {}]   ;;  %s1920_s1 = inlined_call_operand.hbm [shape: f32[8,16], index: 1, kind: input, shape index: {}]   ;;  %s1921_s2 = inlined_call_operand.hbm [shape: f32[8,16], index: 2, kind: input, shape index: {}]   ;;  %s1922_s3 = inlined_call_operand.hbm [shape: f32[8,16], index: 3, kind: input, shape index: {}]   ;;  %s1923_s4 = inlined_call_operand.hbm [shape: f32[8,16], index: 4, kind: input, shape index: {}]   ;;  %s1924_s5 = inlined_call_operand.hbm [shape: f32[8,16], index: 5, kind: input, shape index: {}]   ;;  %s1925_s6 = inlined_call_operand.hbm [shape: f32[8,16], index: 6, kind: input, shape index: {}]   ;;  %s1926_s7 = inlined_call_operand.hbm [shape: f32[8,16], index: 7, kind: input, shape index: {}]   ;;  %s1927_s8 = inlined_call_operand.hbm [shape: f32[96,128], index: 8, kind: input, shape index: {}]   ;;  %s1928_s9 = inlined_call_operand.hbm [shape: bf16[448,128], index: 9, kind: input, shape index: {}]   ;;  %s1929_s10 = inlined_call_operand.hbm [shape: f32[8,32], index: 10, kind: output, shape index: {}]  }
   0x1   :  { %16 = vsyncpa [#allocation6], 0 }
   0x2   :  { %17 = vsyncpa [#allocation9], 0 }
   0x3   :  { %18 = vsyncpa [#allocation12], 0 }
   0x4   :  { %19 = vsyncpa [#allocation15], 0 }
   0x5   :  { %20 = vsyncpa [#allocation18], 0  ;;  %s38_s15 = sshll.u32 %s1920_s1, 4  ;;  %s39_s15 = int_to_ptr.hbm [resolvable:$true] %s38_s15 }
   0x6   :  { %21 = vsyncpa [#allocation4], 0  ;;  %s1661_s16 = smov [#allocation5]   ;;  %s60_s20 = sshll.u32 %s1922_s3, 4  ;;  %s61_s20 = int_to_ptr.hbm [resolvable:$true] %s60_s20 }
   0x7   :  { %s40_s17 = sshll.u32 %s1661_s16, 4  ;;  %s1662_s21 = smov [#allocation8]   ;;  %s41_s17 = int_to_ptr.vmem [resolvable:$true] %s40_s17 }
   0x8   :  { %43 = dma.hbm_to_vmem [thread:$0]  %s39_s15, 128, %s41_s17, [#allocation6]  }
   0x9   :  { %s62_s22 = sshll.u32 %s1662_s21, 4  ;;  %s82_s25 = sshll.u32 %s1924_s5, 4  ;;  %s63_s22 = int_to_ptr.vmem [resolvable:$true] %s62_s22  ;;  %s83_s25 = int_to_ptr.hbm [resolvable:$true] %s82_s25 }
   0xa   :  { %65 = dma.hbm_to_vmem [thread:$0]  %s61_s20, 128, %s63_s22, [#allocation9]  }
   0xb   :  { %s104_s27 = sshll.u32 %s1926_s7, 4  ;;  %s1663_s28 = smov [#allocation11]   ;;  %s105_s27 = int_to_ptr.hbm [resolvable:$true] %s104_s27 }
   0xc   :  { %s84_s29 = sshll.u32 %s1663_s28, 4  ;;  %s1664_s3 = smov [#allocation14]   ;;  %s85_s29 = int_to_ptr.vmem [resolvable:$true] %s84_s29 }
   0xd   :  { %87 = dma.hbm_to_vmem [thread:$0]  %s83_s25, 128, %s85_s29, [#allocation12]  }
   0xe   :  { %s106_s30 = sshll.u32 %s1664_s3, 4  ;;  %s27_s13 = sshll.u32 %s1919_s0, 4  ;;  %s107_s30 = int_to_ptr.vmem [resolvable:$true] %s106_s30  ;;  %s28_s13 = int_to_ptr.hbm [resolvable:$true] %s27_s13 }
   0xf   :  { %109 = dma.hbm_to_vmem [thread:$0]  %s105_s27, 128, %s107_s30, [#allocation15]  }
  0x10   :  { %s49_s15 = sshll.u32 %s1921_s2, 4  ;;  %s1665_s16 = smov [#allocation2]   ;;  %s50_s15 = int_to_ptr.hbm [resolvable:$true] %s49_s15 }
  0x11   :  { %s29_s7 = sshll.u32 %s1665_s16, 4  ;;  %s1666_s17 = smov [#allocation7]   ;;  %s30_s7 = int_to_ptr.vmem [resolvable:$true] %s29_s7 }
  0x12   :  { %32 = dma.hbm_to_vmem [thread:$0]  %s28_s13, 128, %s30_s7, [#allocation3]  }
  0x13   :  { %s51_s18 = sshll.u32 %s1666_s17, 4  ;;  %s71_s21 = sshll.u32 %s1923_s4, 4  ;;  %s52_s18 = int_to_ptr.vmem [resolvable:$true] %s51_s18  ;;  %s72_s21 = int_to_ptr.hbm [resolvable:$true] %s71_s21 }
  0x14   :  { %54 = dma.hbm_to_vmem [thread:$0]  %s50_s15, 128, %s52_s18, [#allocation6]  }
  0x15   :  { %s93_s23 = sshll.u32 %s1925_s6, 4  ;;  %s1667_s24 = smov [#allocation10]   ;;  %s94_s23 = int_to_ptr.hbm [resolvable:$true] %s93_s23 }
  0x16   :  { %s73_s2 = sshll.u32 %s1667_s24, 4  ;;  %s1668_s25 = smov [#allocation13]   ;;  %s74_s2 = int_to_ptr.vmem [resolvable:$true] %s73_s2 }
  0x17   :  { %76 = dma.hbm_to_vmem [thread:$0]  %s72_s21, 128, %s74_s2, [#allocation9]  }
  0x18   :  { %s95_s1 = sshll.u32 %s1668_s25, 4  ;;  %s114_s28 = sshll.u32 %s1927_s8, 4  ;;  %s96_s1 = int_to_ptr.vmem [resolvable:$true] %s95_s1  ;;  %s115_s28 = int_to_ptr.hbm [resolvable:$true] %s114_s28 }
  0x19   :  { %98 = dma.hbm_to_vmem [thread:$0]  %s94_s23, 128, %s96_s1, [#allocation12]  }
  0x1a   :  { %s1669_s4 = smov [#allocation16]   ;;  %s127_s6 = sshll.u32 %s1928_s9, 4  ;;  %s128_s6 = int_to_ptr.hbm [resolvable:$true] %s127_s6 }
  0x1b   :  { %s116_s29 = sshll.u32 %s1669_s4, 4  ;;  %s1670_s11 = smov 128   ;;  %s117_s29 = int_to_ptr.vmem [resolvable:$true] %s116_s29 }
  0x1c   :  { %s1671_s12 = smov 8   ;;  %s1672_s13 = smov [#allocation17]  }
  0x1d   :  { %122 = dma.hbm_to_vmem [thread:$0]  %s115_s28, 1536, %s117_s29, [#allocation15], %s1670_s11, %s1670_s11, %s1671_s12  }
  0x1e   :  { %s129_s5 = sshll.u32 %s1672_s13, 4  ;;  %s1673_s14 = smov 64   ;;  %s130_s5 = int_to_ptr.vmem [resolvable:$true] %s129_s5 }
  0x1f   :  { %s1674_s15 = smov 4  }
  0x20   :  { %135 = dma.hbm_to_vmem [thread:$0]  %s128_s6, 3584, %s130_s5, [#allocation18], %s1673_s14, %s1673_s14, %s1674_s15  }
  0x21   :  { %1647 = dma.done.wait [#allocation3], 128  }
  0x22   :  { %1648 = vsyncadd [#allocation3], 4294967168 }
  0x23   :  { %1649 = dma.done.wait [#allocation6], 256  }
  0x24   :  { %1650 = vsyncadd [#allocation6], 4294967040 }
  0x25   :  { %1651 = dma.done.wait [#allocation9], 256  }
  0x26   :  { %1652 = vsyncadd [#allocation9], 4294967040 }
  0x27   :  { %1653 = dma.done.wait [#allocation12], 256  }
  0x28   :  { %1654 = vsyncadd [#allocation12], 4294967040 }
  0x29   :  { %1655 = dma.done.wait [#allocation15], 1664  }
  0x2a   :  { %1656 = vsyncadd [#allocation15], 4294965632 }
  0x2b   :  { %1657 = dma.done.wait [#allocation18], 3584  }
  0x2c   :  { %1658 = vsyncadd [#allocation18], 4294963712  ;;  %v178_v0 = vld [vmem:[#allocation5] sm:$0xff]  ;;  %v180_v1 = vld [vmem:[#allocation8] sm:$0xff]  ;;  %s1675_s8 = smov 16   ;;  %s1676_s9 = smov 48  }
  0x2d   :  { %186 = vrot.lane.b32.xlu0 %v178_v0, %s1675_s8  ;;  %194 = vrot.lane.b32.xlu1 %v180_v1, %s1676_s9  ;;  %v182_v2 = vld [vmem:[#allocation11] sm:$0xff]  ;;  %s1677_s16 = smov 80   ;;  %v179_v3 = vld [vmem:[#allocation7] sm:$0xff]  ;;  %v181_v4 = vld [vmem:[#allocation10] sm:$0xff]  ;;  %s1678_s7 = smov 32   ;;  %vm213_vm0 = vcmask 130048  }
  0x2e   :  { %202 = vrot.lane.b32.xlu2 %v182_v2, %s1677_s16  ;;  %v183_v5 = vld [vmem:[#allocation13] sm:$0xff]  ;;  %s1679_s17 = smov 96   ;;  %v184_v6 = vld [vmem:[#allocation14] sm:$0xff]  ;;  %s1680_s18 = smov 112   ;;  %v227_v7 = vld [vmem:[#allocation16] sm:$0xff]  ;;  %vm215_vm1 = vcmask 261120  }
  0x2f   :  { %244 = vmatpush.xpose.msra.mxu0 %v227_v7  ;;  %313 = vmatpush.msra.mxu2 %v227_v7  ;;  %v177_v11 = vld [vmem:[#allocation2] sm:$0xff]  ;;  %vm217_vm2 = vcmask 392192   ;;  %vm219_vm3 = vcmask 523264   ;;  %vm221_vm4 = vcmask 654336   ;;  %vm223_vm5 = vcmask 785408   ;;  %v269_v36 = vld [vmem:[#allocation16 + $0x48] sm:$0xff] }
  0x30   :  { %vm225_vm6 = vcmask 916480   ;;  %v270_v38 = vperm.slane %v269_v36, 0  ;;  %v272_v39 = vperm.slane %v269_v36, 1  ;;  %v1290_v46 = vld [vmem:[#allocation17 + $0x38] sm:$0xff]  ;;  %v1289_v48 = vld [vmem:[#allocation17 + $0x30] sm:$0xff]  ;;  %v1288_v50 = vld [vmem:[#allocation17 + $0x28] sm:$0xff] }
  0x31   :  { %385 = vmatpush.bf16.msrb.mxu2 %v1290_v46  ;;  %v1287_v51 = vld [vmem:[#allocation17 + $0x20] sm:$0xff]  ;;  %v1286_v54 = vld [vmem:[#allocation17 + $0x18] sm:$0xff]  ;;  %v1285_v55 = vld [vmem:[#allocation17 + $0x10] sm:$0xff]  ;;  %vm294_vm12 = vcmask 64512   ;;  %s1682_s19 = smov [#allocation19]   ;;  %s1128_s22 = sshll.u32 %s1929_s10, 4  ;;  %s1129_s22 = int_to_ptr.hbm [resolvable:$true] %s1128_s22 }
  0x32   :  { %v1284_v58 = vld [vmem:[#allocation17 + $0x8] sm:$0xff]  ;;  %s1126_s20 = sshll.u32 %s1682_s19, 4  ;;  %s1127_s20 = int_to_ptr.vmem [resolvable:$true] %s1126_s20 }
  0x35   :  { %190 = vrot.lane.b32.xlu0 %v179_v3, %s1678_s7  ;;  %198 = vrot.lane.b32.xlu1 %v181_v4, %s1673_s14  ;;  %v1283_v3 = vld [vmem:[#allocation17] sm:$0xff]  ;;  %v1292_v4 = vld [vmem:[#allocation17 + $0x48] sm:$0xff] }
  0x36   :  { %206 = vrot.lane.b32.xlu2 %v183_v5, %s1679_s17  ;;  %386 = vmatpush.bf16.msrb.mxu2 %v1289_v48 }
  0x37   :  { %450 = vmatpush.bf16.msra.mxu3 %v1292_v4 }
  0x3a   :  { %387 = vmatpush.bf16.msrb.mxu2 %v1288_v50 }
  0x3d   :  { %210 = vrot.lane.b32.xlu0 %v184_v6, %s1680_s18 }
  0x3e   :  { %388 = vmatpush.bf16.msrb.mxu2 %v1287_v51 }
  0x42   :  { %389 = vmatpush.bf16.msrb.mxu2 %v1286_v54 }
  0x46   :  { %390 = vmatpush.bf16.msrb.mxu2 %v1285_v55 }
  0x4a   :  { %391 = vmatpush.bf16.msrb.mxu2 %v1284_v58 }
  0x4e   :  { %392 = vmatpush.bf16.msrb.mxu2 %v1283_v3 }
  0x88   :  { %v203_v10 = vpop.permute.xlu2 %202 }
  0x90   :  { %v207_v18 = vpop.permute.xlu2 %206 }
  0x9f   :  { %v187_v8 = vpop.permute.xlu0 %186  ;;  %v195_v9 = vpop.permute.xlu1 %194 }
  0xa0   :  { %v214_v12 = vsel %vm213_vm0, %v177_v11, %v187_v8  ;;  %v1291_v8 = vld [vmem:[#allocation17 + $0x40] sm:$0xff] }
  0xa1   :  { %451 = vmatpush.bf16.msra.mxu3 %v1291_v8 }
  0xa7   :  { %v191_v13 = vpop.permute.xlu0 %190  ;;  %v199_v14 = vpop.permute.xlu1 %198 }
  0xa8   :  { %v216_v15 = vsel %vm215_vm1, %v214_v12, %v191_v13 }
  0xa9   :  { %v218_v16 = vsel %vm217_vm2, %v216_v15, %v195_v9  ;;  %v336_v9 = vperm.slane %v269_v36, 2  ;;  %v1815_v36 = vld [vmem:[#allocation16 + $0x18] sm:$0xff] }
  0xaa   :  { %v220_v17 = vsel %vm219_vm3, %v218_v16, %v199_v14  ;;  %v1786_v14 = vld [vmem:[#allocation16 + $0x50] sm:$0xff] }
  0xab   :  { %v222_v19 = vsel %vm221_vm4, %v220_v17, %v203_v10  ;;  %v428_v15 = vperm.slane %v1786_v14, 0 }
  0xac   :  { %v224_v20 = vsel %vm223_vm5, %v222_v19, %v207_v18  ;;  %v1790_v19 = vld [vmem:[#allocation16 + $0x28] sm:$0xff] }
  0xaf   :  { %v211_v21 = vpop.permute.xlu0 %210 }
  0xb0   :  { %v1774_v22 = vsel %vm225_vm6, %v224_v20, %v211_v21 }
  0xb1   :  { %245 = vmatmul.f32.vlgmr.msra.gmra.mxu0 %v1774_v22  ;;  %v228_v23 = vmul.f32 %v1774_v22, %v1774_v22 }
  0xb9   :  { %248 = vmatmul.f32.gmra.mxu0 %v228_v23 }
 0x12e   :  { %v246_v24 = vpop.f32.mrf.mxu0 }
 0x12f   :  { %v252_v25 = vmul.f32 0.0625, %v246_v24 }
 0x131   :  { %v253_v26 = vmul.f32 %v252_v25, %v246_v24  ;;  %v271_v44 = vmul.f32 %v270_v38, %v252_v25  ;;  %v1799_v24 = vld [vmem:[#allocation16 + $0x38] sm:$0xff] }
 0x136   :  { %v249_v27 = vpop.f32.mrf.mxu0 }
 0x137   :  { %v254_v28 = vsub.f32 %v249_v27, %v253_v26  ;;  %v1803_v26 = vld [vmem:[#allocation16 + $0x40] sm:$0xff] }
 0x139   :  { %v255_v29 = vmul.f32 0.06666667, %v254_v28  ;;  %v1807_v28 = vld [vmem:[#allocation16 + $0x8] sm:$0xff] }
 0x13b   :  { %v256_v30 = vmax.f32 %v255_v29, 0.0 }
 0x13d   :  { %1333 = vrsqrt.f32 %v256_v30  ;;  %vm264_vm7 = vcmp.eq.f32.partialorder %v256_v30, inf  ;;  %v267_v41 = vand.u32 2147483648, %v256_v30  ;;  %vm266_vm8 = vcmp.eq.f32.partialorder %v256_v30, 0.0 }
 0x143   :  { %v1334_v31 = vpop.eup %1333 }
 0x144   :  { %v258_v32 = vmul.f32 %v1334_v31, %v256_v30 }
 0x146   :  { %v259_v33 = vmul.f32 %v1334_v31, %v258_v32  ;;  %v1811_v32 = vld [vmem:[#allocation16 + $0x10] sm:$0xff] }
 0x148   :  { %v260_v34 = vmul.f32 0.5, %v259_v33 }
 0x14a   :  { %v261_v35 = vsub.f32 1.5, %v260_v34 }
 0x14c   :  { %v262_v37 = vmul.f32 %v1334_v31, %v261_v35 }
 0x14e   :  { %v263_v40 = vmul.f32 %v262_v37, %v256_v30 }
 0x150   :  { %v265_v42 = vsel %vm264_vm7, %v256_v30, %v263_v40  ;;  %v1819_v40 = vld [vmem:[#allocation16 + $0x20] sm:$0xff] }
 0x151   :  { %v268_v43 = vsel %vm266_vm8, %v267_v41, %v265_v42 }
 0x152   :  { %v273_v45 = vmul.f32 %v272_v39, %v268_v43 }
 0x154   :  { %v274_v47 = vadd.f32 %v273_v45, %v271_v44 }
 0x156   :  { %v1143_v49 = vmul.f32 -1.442695, %v274_v47 }
 0x158   :  { %1335 = vpow2.f32 %v1143_v49 }
 0x15e   :  { %v1336_v52 = vpop.eup %1335 }
 0x15f   :  { %v278_v53 = vadd.f32 1.0, %v1336_v52 }
 0x161   :  { %1337 = vrcp.f32 %v278_v53  ;;  %v290_v60 = vand.u32 2147483648, %v278_v53  ;;  %v288_v62 = vand.u32 2147483647, %v278_v53  ;;  %vm284_vm10 = vweird.f32 %v278_v53 }
 0x163   :  { %v291_v0 = vor.u32 1.1754944e-38, %v290_v60  ;;  %vm289_vm13 = vcmp.eq.f32.partialorder %v288_v62, 8.507059e+37 }
 0x167   :  { %v1338_v56 = vpop.eup %1337 }
 0x168   :  { %v280_v57 = vmul.f32 %v1338_v56, %v278_v53  ;;  %vm285_vm9 = vweird.f32 %v1338_v56 }
 0x169   :  { %vm286_vm11 = vmor %vm284_vm10, %vm285_vm9 }
 0x16a   :  { %v281_v59 = vsub.f32 1.0, %v280_v57 }
 0x16c   :  { %v282_v61 = vmul.f32 %v1338_v56, %v281_v59 }
 0x16e   :  { %v283_v63 = vadd.f32 %v1338_v56, %v282_v61 }
 0x170   :  { %v287_v1 = vsel %vm286_vm11, %v1338_v56, %v283_v63 }
 0x171   :  { %v292_v2 = vsel %vm289_vm13, %v291_v0, %v287_v1 }
 0x172   :  { %1144 = vmatmul.msk.f32.vlgmr.msra.gmra.mxu2 %vm294_vm12, %v292_v2 }
 0x1f5   :  { %v315_v5 = vpop.f32.mrf.mxu2 }
 0x1f6   :  { %v318_v6 = vmul.f32 %v315_v5, %v1774_v22  ;;  %v1795_v22 = vld [vmem:[#allocation16 + $0x30] sm:$0xff] }
 0x1f8   :  { %v335_v7 = vpack.c.bf16 %v318_v6, %v318_v6 }
 0x1fa   :  { %393 = vmatmul.bf16.vlgmr.msrb.gmra.mxu2 %v335_v7 }
 0x27d   :  { %v394_v10 = vpop.f32.mrf.mxu2 }
 0x27e   :  { %v1781_v11 = vadd.f32 %v394_v10, %v336_v9 }
 0x280   :  { %v427_v12 = vpack.c.bf16 %v1781_v11, %v1781_v11 }
 0x282   :  { %1185 = vmatmul.msk.bf16.vlgmr.msra.gmra.mxu3 %vm215_vm1, %v427_v12 }
 0x285   :  { %v396_v13 = vpop.f32.mrf.mxu2 }
 0x305   :  { %v453_v16 = vpop.f32.mrf.mxu3 }
 0x306   :  { %v454_v17 = vadd.f32 %v453_v16, %v428_v15  ;;  %v1294_v15 = vld [vmem:[#allocation17 + $0x58] sm:$0xff]  ;;  %v1293_v16 = vld [vmem:[#allocation17 + $0x50] sm:$0xff] }
 0x307   :  { %625 = vmatpush.bf16.msrb.mxu3 %v1294_v15 }
 0x308   :  { %462 = vrot.lane.b32.xlu1 %v454_v17, %s1679_s17  ;;  %v457_v21 = vmul.f32 %v454_v17, %v1790_v19  ;;  %v458_v23 = vmul.f32 %v454_v17, %v1795_v22  ;;  %v459_v25 = vmul.f32 %v454_v17, %v1799_v24  ;;  %v460_v27 = vmul.f32 %v454_v17, %v1803_v26 }
 0x30b   :  { %626 = vmatpush.bf16.msrb.mxu3 %v1293_v16 }
 0x30d   :  { %v455_v18 = vpop.f32.mrf.mxu3 }
 0x37a   :  { %v463_v20 = vpop.permute.xlu1 %462 }
 0x37b   :  { %1186 = vmatpush.xpose.msk.msra.mxu1 %vm215_vm1, %v463_v20 }
 0x37e   :  { %1187 = vmatmul.msk.f32.vlgmr.msra.gmra.mxu1 %vm215_vm1, %v457_v21 }
 0x386   :  { %1188 = vmatmul.msk.f32.gmra.mxu1 %vm215_vm1, %v458_v23 }
 0x38e   :  { %1189 = vmatmul.msk.f32.gmra.mxu1 %vm215_vm1, %v459_v25 }
 0x396   :  { %1190 = vmatmul.msk.f32.gmra.mxu1 %vm215_vm1, %v460_v27 }
 0x3fb   :  { %v495_v29 = vpop.f32.mrf.mxu1 }
 0x3fc   :  { %v496_v30 = vadd.f32 %v495_v29, %v1807_v28 }
 0x3fe   :  { %v507_v31 = vsel %vm294_vm12, %v496_v30, -inf }
 0x3ff   :  { %508 = vmax.xlane.f32.xlu2 %v507_v31 }
 0x403   :  { %v498_v33 = vpop.f32.mrf.mxu1 }
 0x404   :  { %v499_v34 = vadd.f32 %v498_v33, %v1811_v32 }
 0x406   :  { %v510_v35 = vsel %vm294_vm12, %v499_v34, -inf }
 0x407   :  { %511 = vmax.xlane.f32.xlu0 %v510_v35  ;;  %v603_v35 = vperm.slane %v1786_v14, 1 }
 0x40b   :  { %v501_v37 = vpop.f32.mrf.mxu1 }
 0x40c   :  { %v502_v38 = vadd.f32 %v501_v37, %v1815_v36 }
 0x40e   :  { %v513_v39 = vsel %vm294_vm12, %v502_v38, -inf }
 0x40f   :  { %514 = vmax.xlane.f32.xlu1 %v513_v39 }
 0x413   :  { %v504_v41 = vpop.f32.mrf.mxu1 }
 0x414   :  { %v505_v42 = vadd.f32 %v504_v41, %v1819_v40 }
 0x416   :  { %v516_v43 = vsel %vm294_vm12, %v505_v42, -inf }
 0x417   :  { %517 = vmax.xlane.f32.xlu2 %v516_v43  ;;  %v1681_v43 = vmov 32.0  }
 0x428   :  { %551 = vrot.lane.b32.xlu1 %v454_v17, %s1673_s14 }
 0x472   :  { %v509_v44 = vpop.xlane.xlu2 %508 }
 0x473   :  { %v519_v45 = vsub.f32 %v496_v30, %v509_v44 }
 0x475   :  { %v523_v46 = vmul.f32 1.442695, %v519_v45 }
 0x477   :  { %1339 = vpow2.f32 %v523_v46 }
 0x47a   :  { %v512_v47 = vpop.xlane.xlu0 %511 }
 0x47b   :  { %v520_v48 = vsub.f32 %v499_v34, %v512_v47 }
 0x47d   :  { %v1340_v49 = vpop.eup %1339  ;;  %v525_v50 = vmul.f32 1.442695, %v520_v48 }
 0x47e   :  { %v531_v51 = vsel %vm294_vm12, %v1340_v49, 0.0 }
 0x47f   :  { %1341 = vpow2.f32 %v525_v50  ;;  %532 = vadd.xlane.f32.xlu2 %v531_v51 }
 0x482   :  { %v515_v52 = vpop.xlane.xlu1 %514 }
 0x483   :  { %v521_v53 = vsub.f32 %v502_v38, %v515_v52 }
 0x485   :  { %v1342_v54 = vpop.eup %1341  ;;  %v527_v55 = vmul.f32 1.442695, %v521_v53 }
 0x486   :  { %v534_v56 = vsel %vm294_vm12, %v1342_v54, 0.0 }
 0x487   :  { %1343 = vpow2.f32 %v527_v55  ;;  %535 = vadd.xlane.f32.xlu0 %v534_v56  ;;  %v1295_v55 = vld [vmem:[#allocation17 + $0x60] sm:$0xff]  ;;  %v1300_v56 = vld [vmem:[#allocation17 + $0x88] sm:$0xff] }
 0x488   :  { %730 = vmatpush.bf16.msrb.mxu1 %v1300_v56 }
 0x48a   :  { %v518_v57 = vpop.xlane.xlu2 %517 }
 0x48b   :  { %v522_v58 = vsub.f32 %v505_v42, %v518_v57 }
 0x48d   :  { %v1344_v59 = vpop.eup %1343  ;;  %v529_v60 = vmul.f32 1.442695, %v522_v58 }
 0x48e   :  { %v537_v61 = vsel %vm294_vm12, %v1344_v59, 0.0 }
 0x48f   :  { %1345 = vpow2.f32 %v529_v60  ;;  %538 = vadd.xlane.f32.xlu2 %v537_v61 }
 0x495   :  { %v1346_v62 = vpop.eup %1345 }
 0x496   :  { %v540_v63 = vsel %vm294_vm12, %v1346_v62, 0.0 }
 0x497   :  { %541 = vadd.xlane.f32.xlu0 %v540_v63 }
 0x49a   :  { %v552_v0 = vpop.permute.xlu1 %551 }
 0x49b   :  { %581 = vmatpush.msrb.mxu0 %v552_v0 }
 0x4f2   :  { %v533_v1 = vpop.xlane.xlu2 %532 }
 0x4f3   :  { %1347 = vrcp.f32 %v533_v1 }
 0x4f9   :  { %v1348_v2 = vpop.eup %1347 }
 0x4fa   :  { %v536_v3 = vpop.xlane.xlu0 %535  ;;  %v547_v4 = vmul.f32 %v1348_v2, %v1340_v49 }
 0x4fb   :  { %1349 = vrcp.f32 %v536_v3  ;;  %v662_v3 = vperm.slane %v1786_v14, 4 }
 0x4fc   :  { %1191 = vmatmul.msk.f32.vlgmr.msrb.gmra.mxu0 %vm294_vm12, %v547_v4 }
 0x501   :  { %v1350_v5 = vpop.eup %1349 }
 0x502   :  { %v539_v6 = vpop.xlane.xlu2 %538  ;;  %v548_v7 = vmul.f32 %v1350_v5, %v1342_v54  ;;  %v1296_v54 = vld [vmem:[#allocation17 + $0x68] sm:$0xff]  ;;  %v664_v5 = vperm.slane %v1786_v14, 5 }
 0x503   :  { %1351 = vrcp.f32 %v539_v6  ;;  %689 = vmatpush.bf16.msra.mxu3 %v1296_v54 }
 0x504   :  { %1192 = vmatmul.msk.f32.gmra.mxu0 %vm294_vm12, %v548_v7 }
 0x507   :  { %690 = vmatpush.bf16.msra.mxu3 %v1295_v55 }
 0x509   :  { %v1352_v8 = vpop.eup %1351 }
 0x50a   :  { %v542_v9 = vpop.xlane.xlu0 %541  ;;  %v549_v10 = vmul.f32 %v1352_v8, %v1344_v59  ;;  %v1299_v59 = vld [vmem:[#allocation17 + $0x80] sm:$0xff] }
 0x50b   :  { %1353 = vrcp.f32 %v542_v9  ;;  %731 = vmatpush.bf16.msrb.mxu1 %v1299_v59 }
 0x50c   :  { %1193 = vmatmul.msk.f32.gmra.mxu0 %vm294_vm12, %v549_v10  ;;  %1355 = vrcp.f32 %v1681_v43  ;;  %v1298_v10 = vld [vmem:[#allocation17 + $0x78] sm:$0xff] }
 0x50f   :  { %732 = vmatpush.bf16.msrb.mxu1 %v1298_v10 }
 0x511   :  { %v1354_v12 = vpop.eup %1353 }
 0x512   :  { %v550_v13 = vmul.f32 %v1354_v12, %v1346_v62  ;;  %v1356_v44 = vpop.eup %1355  ;;  %v1297_v12 = vld [vmem:[#allocation17 + $0x70] sm:$0xff] }
 0x513   :  { %v637_v45 = vmul.f32 32.0, %v1356_v44  ;;  %vm641_vm14 = vweird.f32 %v1356_v44  ;;  %733 = vmatpush.bf16.msrb.mxu1 %v1297_v12 }
 0x514   :  { %1194 = vmatmul.msk.f32.gmra.mxu0 %vm294_vm12, %v550_v13  ;;  %v667_v13 = vperm.slane %v1786_v14, 2 }
 0x515   :  { %v638_v46 = vsub.f32 1.0, %v637_v45 }
 0x517   :  { %v639_v47 = vmul.f32 %v1356_v44, %v638_v46 }
 0x519   :  { %v640_v48 = vadd.f32 %v1356_v44, %v639_v47 }
 0x51b   :  { %v1840_v49 = vsel %vm641_vm14, %v1356_v44, %v640_v48 }
 0x579   :  { %v583_v17 = vpop.f32.mrf.mxu0 }
 0x57a   :  { %v595_v23 = vmul.f32 %v583_v17, %v1790_v19 }
 0x581   :  { %v586_v18 = vpop.f32.mrf.mxu0 }
 0x582   :  { %v596_v21 = vmul.f32 %v586_v18, %v1795_v22 }
 0x584   :  { %v599_v27 = vadd.f32 %v596_v21, %v595_v23  ;;  %v698_v21 = vperm.slane %v1786_v14, 3 }
 0x589   :  { %v589_v20 = vpop.f32.mrf.mxu0 }
 0x58a   :  { %v597_v25 = vmul.f32 %v589_v20, %v1799_v24 }
 0x58c   :  { %v600_v30 = vadd.f32 %v599_v27, %v597_v25 }
 0x591   :  { %v592_v29 = vpop.f32.mrf.mxu0 }
 0x592   :  { %v598_v31 = vmul.f32 %v592_v29, %v1803_v26 }
 0x594   :  { %v601_v33 = vadd.f32 %v600_v30, %v598_v31 }
 0x596   :  { %v602_v34 = vpack.c.bf16 %v601_v33, %v601_v33 }
 0x598   :  { %1203 = vmatmul.msk.bf16.vlgmr.msrb.gmra.mxu3 %vm215_vm1, %v602_v34 }
 0x61b   :  { %v628_v37 = vpop.f32.mrf.mxu3 }
 0x61c   :  { %v629_v38 = vadd.f32 %v628_v37, %v603_v35 }
 0x61e   :  { %v632_v39 = vadd.f32 %v629_v38, %v1781_v11  ;;  %v1302_v38 = vld [vmem:[#allocation17 + $0x98] sm:$0xff] }
 0x61f   :  { %810 = vmatpush.bf16.msra.mxu2 %v1302_v38 }
 0x620   :  { %v633_v41 = vsel %vm215_vm1, %v632_v39, 0.0 }
 0x621   :  { %634 = vadd.xlane.f32.xlu2 %v633_v41 }
 0x623   :  { %v630_v42 = vpop.f32.mrf.mxu3 }
 0x694   :  { %v635_v50 = vpop.xlane.xlu2 %634 }
 0x695   :  { %v643_v51 = vmul.f32 %v1840_v49, %v635_v50 }
 0x697   :  { %v644_v52 = vsub.f32 %v632_v39, %v643_v51  ;;  %v1301_v39 = vld [vmem:[#allocation17 + $0x90] sm:$0xff]  ;;  %v762_v51 = vperm.slane %v1786_v14, 6 }
 0x698   :  { %811 = vmatpush.bf16.msra.mxu2 %v1301_v39 }
 0x699   :  { %v645_v53 = vmul.f32 %v644_v52, %v644_v52 }
 0x69b   :  { %v646_v11 = vsel %vm215_vm1, %v645_v53, 0.0  ;;  %v764_v53 = vperm.slane %v1786_v14, 7 }
 0x69c   :  { %647 = vadd.xlane.f32.xlu0 %v646_v11 }
 0x70f   :  { %v648_v57 = vpop.xlane.xlu0 %647 }
 0x710   :  { %v649_v58 = vmul.f32 %v648_v57, %v1840_v49  ;;  %v1862_v57 = vld [vmem:[#allocation16 + $0x58] sm:$0xff] }
 0x712   :  { %v650_v60 = vadd.f32 1e-05, %v649_v58  ;;  %v788_v58 = vperm.slane %v1862_v57, 0 }
 0x714   :  { %1357 = vrsqrt.f32 %v650_v60  ;;  %vm657_vm0 = vweird.f32 %v650_v60 }
 0x71a   :  { %v1358_v61 = vpop.eup %1357 }
 0x71b   :  { %v652_v62 = vmul.f32 %v1358_v61, %v650_v60  ;;  %vm658_vm15 = vweird.f32 %v1358_v61 }
 0x71c   :  { %vm659_vm2 = vmor %vm657_vm0, %vm658_vm15 }
 0x71d   :  { %v653_v63 = vmul.f32 %v1358_v61, %v652_v62 }
 0x71f   :  { %v654_v0 = vmul.f32 0.5, %v653_v63 }
 0x721   :  { %v655_v1 = vsub.f32 1.5, %v654_v0 }
 0x723   :  { %v656_v2 = vmul.f32 %v1358_v61, %v655_v1 }
 0x725   :  { %v660_v4 = vsel %vm659_vm2, %v1358_v61, %v656_v2 }
 0x726   :  { %v661_v6 = vmul.f32 %v660_v4, %v644_v52 }
 0x728   :  { %v663_v7 = vmul.f32 %v662_v3, %v661_v6 }
 0x72a   :  { %v665_v8 = vadd.f32 %v664_v5, %v663_v7 }
 0x72c   :  { %v666_v9 = vpack.c.bf16 %v665_v8, %v665_v8 }
 0x72e   :  { %1212 = vmatmul.msk.bf16.vlgmr.msra.gmra.mxu3 %vm215_vm1, %v666_v9 }
 0x7b1   :  { %v692_v15 = vpop.f32.mrf.mxu3 }
 0x7b2   :  { %v693_v16 = vadd.f32 %v692_v15, %v667_v13 }
 0x7b4   :  { %v696_v17 = vmax.f32 %v693_v16, 0.0 }
 0x7b6   :  { %v697_v18 = vpack.c.bf16 %v696_v17, %v696_v17 }
 0x7b8   :  { %1229 = vmatmul.msk.bf16.vlgmr.msrb.gmra.mxu1 %vm219_vm3, %v697_v18 }
 0x7b9   :  { %v694_v20 = vpop.f32.mrf.mxu3 }
 0x835   :  { %v735_v23 = vpop.f32.mrf.mxu1 }
 0x836   :  { %v736_v25 = vadd.f32 %v735_v23, %v698_v21 }
 0x838   :  { %v739_v27 = vadd.f32 %v736_v25, %v665_v8 }
 0x83a   :  { %v740_v29 = vsel %vm215_vm1, %v739_v27, 0.0 }
 0x83b   :  { %741 = vadd.xlane.f32.xlu2 %v740_v29 }
 0x83d   :  { %v737_v30 = vpop.f32.mrf.mxu1 }
 0x8ae   :  { %v742_v31 = vpop.xlane.xlu2 %741 }
 0x8af   :  { %v743_v33 = vmul.f32 %v742_v31, %v1840_v49 }
 0x8b1   :  { %v744_v34 = vsub.f32 %v739_v27, %v743_v33 }
 0x8b3   :  { %v745_v35 = vmul.f32 %v744_v34, %v744_v34 }
 0x8b5   :  { %v746_v37 = vsel %vm215_vm1, %v745_v35, 0.0 }
 0x8b6   :  { %747 = vadd.xlane.f32.xlu0 %v746_v37 }
 0x929   :  { %v748_v41 = vpop.xlane.xlu0 %747 }
 0x92a   :  { %v749_v42 = vmul.f32 %v748_v41, %v1840_v49 }
 0x92c   :  { %v750_v43 = vadd.f32 1e-05, %v749_v42 }
 0x92e   :  { %1359 = vrsqrt.f32 %v750_v43  ;;  %vm757_vm5 = vweird.f32 %v750_v43 }
 0x934   :  { %v1360_v44 = vpop.eup %1359 }
 0x935   :  { %v752_v45 = vmul.f32 %v1360_v44, %v750_v43  ;;  %vm758_vm4 = vweird.f32 %v1360_v44 }
 0x936   :  { %vm759_vm6 = vmor %vm757_vm5, %vm758_vm4 }
 0x937   :  { %v753_v46 = vmul.f32 %v1360_v44, %v752_v45 }
 0x939   :  { %v754_v47 = vmul.f32 0.5, %v753_v46 }
 0x93b   :  { %v755_v48 = vsub.f32 1.5, %v754_v47 }
 0x93d   :  { %v756_v50 = vmul.f32 %v1360_v44, %v755_v48 }
 0x93f   :  { %v760_v52 = vsel %vm759_vm6, %v1360_v44, %v756_v50 }
 0x940   :  { %v761_v11 = vmul.f32 %v760_v52, %v744_v34 }
 0x942   :  { %v763_v54 = vmul.f32 %v762_v51, %v761_v11  ;;  %v1304_v11 = vld [vmem:[#allocation17 + $0xa8] sm:$0xff] }
 0x943   :  { %985 = vmatpush.bf16.msra.mxu1 %v1304_v11 }
 0x944   :  { %v1857_v55 = vadd.f32 %v764_v53, %v763_v54  ;;  %v1303_v54 = vld [vmem:[#allocation17 + $0xa0] sm:$0xff] }
 0x946   :  { %v787_v56 = vpack.c.bf16 %v1857_v55, %v1857_v55 }
 0x947   :  { %986 = vmatpush.bf16.msra.mxu1 %v1303_v54 }
 0x948   :  { %1238 = vmatmul.msk.bf16.vlgmr.msra.gmra.mxu2 %vm215_vm1, %v787_v56 }
 0x9cb   :  { %v813_v59 = vpop.f32.mrf.mxu2 }
 0x9cc   :  { %v814_v60 = vadd.f32 %v813_v59, %v788_v58 }
 0x9ce   :  { %822 = vrot.lane.b32.xlu1 %v814_v60, %s1679_s17  ;;  %v817_v14 = vmul.f32 %v814_v60, %v1790_v19  ;;  %v818_v63 = vmul.f32 %v814_v60, %v1795_v22  ;;  %v819_v0 = vmul.f32 %v814_v60, %v1799_v24  ;;  %v820_v1 = vmul.f32 %v814_v60, %v1803_v26 }
 0x9d3   :  { %v815_v61 = vpop.f32.mrf.mxu2 }
 0xa40   :  { %v823_v62 = vpop.permute.xlu1 %822 }
 0xa41   :  { %1239 = vmatpush.xpose.msk.msra.mxu0 %vm215_vm1, %v823_v62 }
 0xa44   :  { %1240 = vmatmul.msk.f32.vlgmr.msra.gmra.mxu0 %vm215_vm1, %v817_v14 }
 0xa4c   :  { %1241 = vmatmul.msk.f32.gmra.mxu0 %vm215_vm1, %v818_v63 }
 0xa54   :  { %1242 = vmatmul.msk.f32.gmra.mxu0 %vm215_vm1, %v819_v0 }
 0xa5c   :  { %1243 = vmatmul.msk.f32.gmra.mxu0 %vm215_vm1, %v820_v1 }
 0xac1   :  { %v855_v2 = vpop.f32.mrf.mxu0 }
 0xac2   :  { %v856_v3 = vadd.f32 %v855_v2, %v1807_v28 }
 0xac4   :  { %v867_v4 = vsel %vm294_vm12, %v856_v3, -inf }
 0xac5   :  { %868 = vmax.xlane.f32.xlu2 %v867_v4  ;;  %v963_v4 = vperm.slane %v1862_v57, 1 }
 0xac9   :  { %v858_v5 = vpop.f32.mrf.mxu0 }
 0xaca   :  { %v859_v6 = vadd.f32 %v858_v5, %v1811_v32 }
 0xacc   :  { %v870_v7 = vsel %vm294_vm12, %v859_v6, -inf }
 0xacd   :  { %871 = vmax.xlane.f32.xlu0 %v870_v7 }
 0xad1   :  { %v861_v8 = vpop.f32.mrf.mxu0 }
 0xad2   :  { %v862_v9 = vadd.f32 %v861_v8, %v1815_v36 }
 0xad4   :  { %v873_v10 = vsel %vm294_vm12, %v862_v9, -inf }
 0xad5   :  { %874 = vmax.xlane.f32.xlu1 %v873_v10 }
 0xad9   :  { %v864_v12 = vpop.f32.mrf.mxu0 }
 0xada   :  { %v865_v13 = vadd.f32 %v864_v12, %v1819_v40  ;;  %v1306_v12 = vld [vmem:[#allocation17 + $0xb8] sm:$0xff] }
 0xadb   :  { %1042 = vmatpush.bf16.msrb.mxu2 %v1306_v12 }
 0xadc   :  { %v876_v28 = vsel %vm294_vm12, %v865_v13, -inf }
 0xadd   :  { %877 = vmax.xlane.f32.xlu2 %v876_v28  ;;  %v1310_v28 = vld [vmem:[#allocation17 + $0xd8] sm:$0xff] }
 0xade   :  { %1083 = vmatpush.bf16.msrb.mxu1 %v1310_v28 }
 0xb38   :  { %v869_v15 = vpop.xlane.xlu2 %868 }
 0xb39   :  { %v879_v16 = vsub.f32 %v856_v3, %v869_v15 }
 0xb3b   :  { %v883_v17 = vmul.f32 1.442695, %v879_v16  ;;  %v1309_v16 = vld [vmem:[#allocation17 + $0xd0] sm:$0xff] }
 0xb3c   :  { %1084 = vmatpush.bf16.msrb.mxu1 %v1309_v16 }
 0xb3d   :  { %1361 = vpow2.f32 %v883_v17 }
 0xb40   :  { %v872_v32 = vpop.xlane.xlu0 %871 }
 0xb41   :  { %v880_v18 = vsub.f32 %v859_v6, %v872_v32 }
 0xb43   :  { %v1362_v20 = vpop.eup %1361  ;;  %v885_v21 = vmul.f32 1.442695, %v880_v18 }
 0xb44   :  { %v891_v23 = vsel %vm294_vm12, %v1362_v20, 0.0 }
 0xb45   :  { %1363 = vpow2.f32 %v885_v21  ;;  %892 = vadd.xlane.f32.xlu0 %v891_v23 }
 0xb48   :  { %v875_v36 = vpop.xlane.xlu1 %874 }
 0xb49   :  { %v881_v25 = vsub.f32 %v862_v9, %v875_v36 }
 0xb4b   :  { %v1364_v27 = vpop.eup %1363  ;;  %v887_v29 = vmul.f32 1.442695, %v881_v25  ;;  %v1015_v25 = vperm.slane %v1862_v57, 4 }
 0xb4c   :  { %v894_v40 = vsel %vm294_vm12, %v1364_v27, 0.0 }
 0xb4d   :  { %1365 = vpow2.f32 %v887_v29  ;;  %895 = vadd.xlane.f32.xlu2 %v894_v40  ;;  %v1017_v29 = vperm.slane %v1862_v57, 5 }
 0xb50   :  { %v878_v30 = vpop.xlane.xlu2 %877 }
 0xb51   :  { %v882_v31 = vsub.f32 %v865_v13, %v878_v30  ;;  %v1305_v13 = vld [vmem:[#allocation17 + $0xb0] sm:$0xff] }
 0xb52   :  { %1043 = vmatpush.bf16.msrb.mxu2 %v1305_v13 }
 0xb53   :  { %v1366_v33 = vpop.eup %1365  ;;  %v889_v34 = vmul.f32 1.442695, %v882_v31 }
 0xb54   :  { %v897_v35 = vsel %vm294_vm12, %v1366_v33, 0.0 }
 0xb55   :  { %1367 = vpow2.f32 %v889_v34  ;;  %898 = vadd.xlane.f32.xlu2 %v897_v35  ;;  %v1308_v34 = vld [vmem:[#allocation17 + $0xc8] sm:$0xff]  ;;  %v1307_v35 = vld [vmem:[#allocation17 + $0xc0] sm:$0xff] }
 0xb56   :  { %1085 = vmatpush.bf16.msrb.mxu1 %v1308_v34 }
 0xb59   :  { %911 = vrot.lane.b32.xlu0 %v814_v60, %s1673_s14 }
 0xb5a   :  { %1086 = vmatpush.bf16.msrb.mxu1 %v1307_v35 }
 0xb5b   :  { %v1368_v37 = vpop.eup %1367 }
 0xb5c   :  { %v900_v38 = vsel %vm294_vm12, %v1368_v37, 0.0 }
 0xb5d   :  { %901 = vadd.xlane.f32.xlu2 %v900_v38 }
 0xbb8   :  { %v893_v39 = vpop.xlane.xlu0 %892 }
 0xbb9   :  { %1369 = vrcp.f32 %v893_v39 }
 0xbbf   :  { %v1370_v42 = vpop.eup %1369 }
 0xbc0   :  { %v896_v41 = vpop.xlane.xlu2 %895  ;;  %v907_v43 = vmul.f32 %v1370_v42, %v1362_v20 }
 0xbc1   :  { %1371 = vrcp.f32 %v896_v41 }
 0xbc7   :  { %v1372_v46 = vpop.eup %1371 }
 0xbc8   :  { %v899_v45 = vpop.xlane.xlu2 %898  ;;  %v908_v47 = vmul.f32 %v1372_v46, %v1364_v27 }
 0xbc9   :  { %1373 = vrcp.f32 %v899_v45 }
 0xbcb   :  { %v912_v44 = vpop.permute.xlu0 %911 }
 0xbcc   :  { %941 = vmatpush.msrb.mxu3 %v912_v44  ;;  %v1051_v44 = vperm.slane %v1862_v57, 3 }
 0xbcd   :  { %1244 = vmatmul.msk.f32.vlgmr.msrb.gmra.mxu3 %vm294_vm12, %v907_v43 }
 0xbcf   :  { %v1374_v50 = vpop.eup %1373 }
 0xbd0   :  { %v902_v48 = vpop.xlane.xlu2 %901  ;;  %v909_v51 = vmul.f32 %v1374_v50, %v1366_v33 }
 0xbd1   :  { %1375 = vrcp.f32 %v902_v48 }
 0xbd5   :  { %1245 = vmatmul.msk.f32.gmra.mxu3 %vm294_vm12, %v908_v47 }
 0xbd7   :  { %v1376_v52 = vpop.eup %1375 }
 0xbd8   :  { %v910_v53 = vmul.f32 %v1376_v52, %v1368_v37  ;;  %v1020_v37 = vperm.slane %v1862_v57, 2 }
 0xbdd   :  { %1246 = vmatmul.msk.f32.gmra.mxu3 %vm294_vm12, %v909_v51 }
 0xbe5   :  { %1247 = vmatmul.msk.f32.gmra.mxu3 %vm294_vm12, %v910_v53 }
 0xc50   :  { %v943_v56 = vpop.f32.mrf.mxu3 }
 0xc51   :  { %v955_v61 = vmul.f32 %v943_v56, %v1790_v19 }
 0xc58   :  { %v946_v58 = vpop.f32.mrf.mxu3 }
 0xc59   :  { %v956_v60 = vmul.f32 %v946_v58, %v1795_v22 }
 0xc5b   :  { %v959_v14 = vadd.f32 %v956_v60, %v955_v61 }
 0xc60   :  { %v949_v59 = vpop.f32.mrf.mxu3 }
 0xc61   :  { %v957_v62 = vmul.f32 %v949_v59, %v1799_v24 }
 0xc63   :  { %v960_v0 = vadd.f32 %v959_v14, %v957_v62 }
 0xc68   :  { %v952_v63 = vpop.f32.mrf.mxu3 }
 0xc69   :  { %v958_v1 = vmul.f32 %v952_v63, %v1803_v26 }
 0xc6b   :  { %v961_v2 = vadd.f32 %v960_v0, %v958_v1  ;;  %v1115_v1 = vperm.slane %v1862_v57, 6 }
 0xc6d   :  { %v962_v3 = vpack.c.bf16 %v961_v2, %v961_v2 }
 0xc6f   :  { %1256 = vmatmul.msk.bf16.vlgmr.msra.gmra.mxu1 %vm215_vm1, %v962_v3  ;;  %v1117_v3 = vperm.slane %v1862_v57, 7 }
 0xcec   :  { %v988_v5 = vpop.f32.mrf.mxu1 }
 0xced   :  { %v989_v6 = vadd.f32 %v988_v5, %v963_v4 }
 0xcef   :  { %v992_v7 = vadd.f32 %v989_v6, %v1857_v55 }
 0xcf1   :  { %v993_v22 = vsel %vm215_vm1, %v992_v7, 0.0 }
 0xcf2   :  { %994 = vadd.xlane.f32.xlu0 %v993_v22 }
 0xcf4   :  { %v990_v19 = vpop.f32.mrf.mxu1 }
 0xd65   :  { %v995_v24 = vpop.xlane.xlu0 %994 }
 0xd66   :  { %v996_v8 = vmul.f32 %v995_v24, %v1840_v49 }
 0xd68   :  { %v997_v9 = vsub.f32 %v992_v7, %v996_v8 }
 0xd6a   :  { %v998_v10 = vmul.f32 %v997_v9, %v997_v9 }
 0xd6c   :  { %v999_v26 = vsel %vm215_vm1, %v998_v10, 0.0 }
 0xd6d   :  { %1000 = vadd.xlane.f32.xlu2 %v999_v26 }
 0xde0   :  { %v1001_v15 = vpop.xlane.xlu2 %1000 }
 0xde1   :  { %v1002_v55 = vmul.f32 %v1001_v15, %v1840_v49 }
 0xde3   :  { %v1003_v17 = vadd.f32 1e-05, %v1002_v55 }
 0xde5   :  { %1377 = vrsqrt.f32 %v1003_v17  ;;  %vm1010_vm8 = vweird.f32 %v1003_v17 }
 0xdeb   :  { %v1378_v32 = vpop.eup %1377 }
 0xdec   :  { %v1005_v18 = vmul.f32 %v1378_v32, %v1003_v17  ;;  %vm1011_vm7 = vweird.f32 %v1378_v32 }
 0xded   :  { %vm1012_vm9 = vmor %vm1010_vm8, %vm1011_vm7 }
 0xdee   :  { %v1006_v20 = vmul.f32 %v1378_v32, %v1005_v18 }
 0xdf0   :  { %v1007_v21 = vmul.f32 0.5, %v1006_v20 }
 0xdf2   :  { %v1008_v23 = vsub.f32 1.5, %v1007_v21 }
 0xdf4   :  { %v1009_v36 = vmul.f32 %v1378_v32, %v1008_v23 }
 0xdf6   :  { %v1013_v27 = vsel %vm1012_vm9, %v1378_v32, %v1009_v36 }
 0xdf7   :  { %v1014_v40 = vmul.f32 %v1013_v27, %v997_v9 }
 0xdf9   :  { %v1016_v30 = vmul.f32 %v1015_v25, %v1014_v40 }
 0xdfb   :  { %v1018_v31 = vadd.f32 %v1017_v29, %v1016_v30 }
 0xdfd   :  { %v1019_v33 = vpack.c.bf16 %v1018_v31, %v1018_v31 }
 0xdff   :  { %1265 = vmatmul.msk.bf16.vlgmr.msrb.gmra.mxu2 %vm215_vm1, %v1019_v33 }
 0xe82   :  { %v1045_v38 = vpop.f32.mrf.mxu2 }
 0xe83   :  { %v1046_v39 = vadd.f32 %v1045_v38, %v1020_v37 }
 0xe85   :  { %v1049_v41 = vmax.f32 %v1046_v39, 0.0 }
 0xe87   :  { %v1050_v42 = vpack.c.bf16 %v1049_v41, %v1049_v41 }
 0xe89   :  { %1282 = vmatmul.msk.bf16.vlgmr.msrb.gmra.mxu1 %vm219_vm3, %v1050_v42 }
 0xe8a   :  { %v1047_v43 = vpop.f32.mrf.mxu2 }
 0xf06   :  { %v1088_v45 = vpop.f32.mrf.mxu1 }
 0xf07   :  { %v1089_v46 = vadd.f32 %v1088_v45, %v1051_v44 }
 0xf09   :  { %v1092_v47 = vadd.f32 %v1089_v46, %v1018_v31 }
 0xf0b   :  { %v1093_v48 = vsel %vm215_vm1, %v1092_v47, 0.0 }
 0xf0c   :  { %1094 = vadd.xlane.f32.xlu1 %v1093_v48 }
 0xf0e   :  { %v1090_v50 = vpop.f32.mrf.mxu1 }
 0xf7f   :  { %v1095_v51 = vpop.xlane.xlu1 %1094 }
 0xf80   :  { %v1096_v52 = vmul.f32 %v1095_v51, %v1840_v49 }
 0xf82   :  { %v1097_v53 = vsub.f32 %v1092_v47, %v1096_v52 }
 0xf84   :  { %v1098_v11 = vmul.f32 %v1097_v53, %v1097_v53 }
 0xf86   :  { %v1099_v54 = vsel %vm215_vm1, %v1098_v11, 0.0 }
 0xf87   :  { %1100 = vadd.xlane.f32.xlu2 %v1099_v54 }
 0xffa   :  { %v1101_v56 = vpop.xlane.xlu2 %1100 }
 0xffb   :  { %v1102_v58 = vmul.f32 %v1101_v56, %v1840_v49 }
 0xffd   :  { %v1103_v59 = vadd.f32 1e-05, %v1102_v58 }
 0xfff   :  { %1379 = vrsqrt.f32 %v1103_v59  ;;  %vm1110_vm10 = vweird.f32 %v1103_v59 }
0x1005   :  { %v1380_v60 = vpop.eup %1379 }
0x1006   :  { %v1105_v61 = vmul.f32 %v1380_v60, %v1103_v59  ;;  %vm1111_vm3 = vweird.f32 %v1380_v60 }
0x1007   :  { %vm1112_vm11 = vmor %vm1110_vm10, %vm1111_vm3 }
0x1008   :  { %v1106_v62 = vmul.f32 %v1380_v60, %v1105_v61 }
0x100a   :  { %v1107_v14 = vmul.f32 0.5, %v1106_v62 }
0x100c   :  { %v1108_v63 = vsub.f32 1.5, %v1107_v14 }
0x100e   :  { %v1109_v0 = vmul.f32 %v1380_v60, %v1108_v63 }
0x1010   :  { %v1113_v2 = vsel %vm1112_vm11, %v1380_v60, %v1109_v0 }
0x1011   :  { %v1114_v4 = vmul.f32 %v1113_v2, %v1097_v53 }
0x1013   :  { %v1116_v5 = vmul.f32 %v1115_v1, %v1114_v4 }
0x1015   :  { %v1118_v6 = vadd.f32 %v1117_v3, %v1116_v5 }
0x1017   :  { %1381 = vtanh.f32 %v1118_v6 }
0x101d   :  { %v1382_v49 = vpop.eup %1381 }
0x101e   :  { %1120 = vst.msk [vmem:[#allocation19] sm:$0xff] %vm215_vm1, %v1382_v49 }
0x101f   :  { %1131 = dma.vmem_to_hbm [thread:$0]  %s1127_s20, 128, %s1129_s22, [#allocation4]  }
0x1020   :  { %1659 = dma.done.wait [#allocation4], 128  }
0x1021   :  { %1660 = vsyncadd [#allocation4], 4294967168 }
0x1022   :  { %1136 = vsyncpa [#allocation3], 1 }
0x1023   :  { %1137 = vsyncpa [#allocation6], 1 }
0x1024   :  { %1138 = vsyncpa [#allocation9], 1 }
0x1025   :  { %1139 = vsyncpa [#allocation12], 1 }
0x1026   :  { %1140 = vsyncpa [#allocation15], 1 }
0x1027   :  { %1141 = vsyncpa [#allocation18], 1 }
0x1028   :  { %1142 = vsyncpa [#allocation4], 1 }

</bundles_post_ra>
